<compile_context>
chip_gen: v7x
topology: tpu7x:2x2x1
jax: 0.10.0
libtpu: 0.0.40
codegen_flags: <defaults>
</compile_context>

<pallas_src>
import math

import jax
import jax.numpy as jnp
from jax.experimental import pallas as pl


# --------------------------------------------------------------------------- kernel
def _bilstm_kernel(gi_ref, whh_ref, h0_ref, c0_ref, out_ref, hn_ref, cn_ref):
    """Fused bidirectional LSTM recurrence.

    gi_ref : (S, B, 8H) f32  precomputed x@W_ih + b for both directions
                              (columns [0:4H] = forward gates, [4H:8H] = backward gates)
    whh_ref: (2H, 8H) bf16   block-diagonal [[W_hh_fwd, 0], [0, W_hh_bwd]]
    h0_ref : (B, 2H) f32     [h0_fwd | h0_bwd]
    c0_ref : (B, 2H) f32     [c0_fwd | c0_bwd]
    out_ref: (S, B, 2H) f32  bidirectional hidden sequence (fwd | bwd per timestep)
    hn_ref : (2, B, H) f32   final hidden states (PyTorch h_n layout)
    cn_ref : (2, B, H) f32   final cell states   (PyTorch c_n layout)
    """
    S = gi_ref.shape[0]
    H = gi_ref.shape[2] // 8
    H4 = 4 * H

    w_hh = whh_ref[...]                       # (2H, 8H) bf16, block-diagonal

    h_f = h0_ref[:, :H]
    h_b = h0_ref[:, H:]
    c_f = c0_ref[:, :H]
    c_b = c0_ref[:, H:]

    def cell(gates, c_prev):                  # PyTorch gate order i, f, g, o; f32 math
        i = jax.nn.sigmoid(gates[:, 0:H])
        f = jax.nn.sigmoid(gates[:, H:2 * H])
        g = jnp.tanh(gates[:, 2 * H:3 * H])
        o = jax.nn.sigmoid(gates[:, 3 * H:4 * H])
        c = f * c_prev + i * g
        h = o * jnp.tanh(c)
        return h, c

    # Fully unrolled static time loop (S is small & static).  One bf16 MXU dot per step
    # serves both directions through the block-diagonal recurrence weight; only the
    # h @ W_hh term remains on the serial critical path.
    for t in range(S):
        tb = S - 1 - t                        # backward direction's time index
        h_cat = jnp.concatenate([h_f, h_b], axis=1).astype(jnp.bfloat16)   # (B, 2H)
        gh = jnp.dot(h_cat, w_hh, preferred_element_type=jnp.float32)      # (B, 8H)

        gi_f = gi_ref[t]                      # (B, 8H)
        gi_b = gi_ref[tb]
        h_f, c_f = cell(gi_f[:, :H4] + gh[:, :H4], c_f)
        h_b, c_b = cell(gi_b[:, H4:] + gh[:, H4:], c_b)

        # out block is VMEM-resident; these are cheap in-VMEM stores.  The HBM
        # writeback of the full (S, B, 2H) slab happens once, lane-dense, at kernel end.
        out_ref[t, :, 0:H] = h_f
        out_ref[tb, :, H:2 * H] = h_b

    # Final states written exactly once (PyTorch layout: [fwd, bwd]).
    hn_ref[0] = h_f
    hn_ref[1] = h_b
    cn_ref[0] = c_f
    cn_ref[1] = c_b


# --------------------------------------------------------------------------- wrapper
@jax.jit
def bilstm_forward(x, params):
    """x: (B, S, E) f32 -> (output (S, B, 2H), (h_n (2, B, H), c_n (2, B, H)))."""
    B, S, E = x.shape
    H = params['w_hh_f'].shape[0]

    x_t = jnp.transpose(x, (1, 0, 2)).astype(jnp.float32)          # (S, B, E) time-major

    # Fused input weights / biases for both directions.
    w_ih = jnp.concatenate([params['w_ih_f'], params['w_ih_b']], axis=1)          # (E, 8H)
    b = jnp.concatenate([params['b_ih_f'] + params['b_hh_f'],
                         params['b_ih_b'] + params['b_hh_b']], axis=1)            # (1, 8H)

    # Hoisted input projection (no time dependency): one matmul for all timesteps and
    # both directions, bias folded in; bf16 MXU operands, f32 accumulation.
    gi = jnp.dot(x_t.reshape(S * B, E).astype(jnp.bfloat16),
                 w_ih.astype(jnp.bfloat16),
                 preferred_element_type=jnp.float32) + b
    gi = gi.reshape(S, B, 8 * H)

    # Block-diagonal recurrence weight so one in-kernel dot handles both directions.
    w_hh = jnp.zeros((2 * H, 8 * H), jnp.float32)
    w_hh = w_hh.at[:H, :4 * H].set(params['w_hh_f'])
    w_hh = w_hh.at[H:, 4 * H:].set(params['w_hh_b'])
    w_hh = w_hh.astype(jnp.bfloat16)

    h0 = jnp.concatenate([params['h0'][0], params['h0'][1]], axis=1)   # (B, 2H)
    c0 = jnp.concatenate([params['c0'][0], params['c0'][1]], axis=1)   # (B, 2H)

    out, h_n, c_n = pl.pallas_call(
        _bilstm_kernel,
        out_shape=(jax.ShapeDtypeStruct((S, B, 2 * H), jnp.float32),
                   jax.ShapeDtypeStruct((2, B, H), jnp.float32),
                   jax.ShapeDtypeStruct((2, B, H), jnp.float32)),
        # No grid / BlockSpecs: everything fits VMEM as single whole-array blocks.
    )(gi, w_hh, h0, c0)
    return out, (h_n, c_n)


# --------------------------------------------------------------------------- reference
def bilstm_reference(x, params):
    """Pure-JAX f32 reference of the same bidirectional LSTM forward."""
    H = params['w_hh_f'].shape[0]
    xs = jnp.transpose(x, (1, 0, 2))                                # (S, B, E)

    def run_dir(x_seq, w_ih, w_hh, b_ih, b_hh, h0, c0):
        def step(carry, x_t):
            h, c = carry
            gates = x_t @ w_ih + h @ w_hh + b_ih + b_hh
            i = jax.nn.sigmoid(gates[:, 0:H])
            f = jax.nn.sigmoid(gates[:, H:2 * H])
            g = jnp.tanh(gates[:, 2 * H:3 * H])
            o = jax.nn.sigmoid(gates[:, 3 * H:4 * H])
            c = f * c + i * g
            h = o * jnp.tanh(c)
            return (h, c), h
        (hT, cT), hs = jax.lax.scan(step, (h0, c0), x_seq)
        return hs, hT, cT

    hs_f, hT_f, cT_f = run_dir(xs, params['w_ih_f'], params['w_hh_f'],
                               params['b_ih_f'], params['b_hh_f'],
                               params['h0'][0], params['c0'][0])
    hs_b_r, hT_b, cT_b = run_dir(xs[::-1], params['w_ih_b'], params['w_hh_b'],
                                 params['b_ih_b'], params['b_hh_b'],
                                 params['h0'][1], params['c0'][1])
    out = jnp.concatenate([hs_f, hs_b_r[::-1]], axis=-1)
    return out, (jnp.stack([hT_f, hT_b]), jnp.stack([cT_f, cT_b]))


# --------------------------------------------------------------------------- params
def init_params(key, E, H, B):
    ks = jax.random.split(key, 10)
    s = 1.0 / math.sqrt(H)

    def u(k, shape):
        return jax.random.uniform(k, shape, jnp.float32, -s, s)

    return {
        # nn.LSTM weights stored pre-transposed as (in_features, 4H); gate order i,f,g,o.
        'w_ih_f': u(ks[0], (E, 4 * H)),
        'w_hh_f': u(ks[1], (H, 4 * H)),
        'b_ih_f': u(ks[2], (1, 4 * H)),
        'b_hh_f': u(ks[3], (1, 4 * H)),
        'w_ih_b': u(ks[4], (E, 4 * H)),
        'w_hh_b': u(ks[5], (H, 4 * H)),
        'b_ih_b': u(ks[6], (1, 4 * H)),
        'b_hh_b': u(ks[7], (1, 4 * H)),
        # TODO(synk): reference draws torch.randn(h0, c0) on every forward call;
        # fixed deterministic normals are used here instead.
        'h0': jax.random.normal(ks[8], (2, B, H), jnp.float32),
        'c0': jax.random.normal(ks[9], (2, B, H), jnp.float32),
    }


# --------------------------------------------------------------------------- main
if __name__ == "__main__":
    B = 2      # batch
    S = 8      # sequence length
    E = 32     # embedding_dim
    H = 32     # hidden_size

    key = jax.random.PRNGKey(0)
    pkey, xkey = jax.random.split(key)
    params = init_params(pkey, E, H, B)
    x = jax.random.normal(xkey, (B, S, E), jnp.float32)             # (batch, seq, emb)

    out, (h_n, c_n) = jax.block_until_ready(bilstm_forward(x, params))
    assert out.shape == (S, B, 2 * H), out.shape
    assert h_n.shape == (2, B, H) and c_n.shape == (2, B, H)

    # Correctness vs. pure-JAX f32 reference (kernel MXU operands are bf16).
    ref_out, (ref_hn, ref_cn) = bilstm_reference(x, params)
    err = max(float(jnp.max(jnp.abs(out - ref_out))),
              float(jnp.max(jnp.abs(h_n - ref_hn))),
              float(jnp.max(jnp.abs(c_n - ref_cn))))
    assert err < 5e-2, f"max abs error vs reference: {err}"

    print("KERNEL_OK")
</pallas_src>

<mosaic_0001>
module attributes {stable_mosaic.version = 11 : i64} {
  func.func @_bilstm_kernel(%arg0: memref<8x2x256xf32, #tpu.memory_space<vmem>>, %arg1: memref<64x256xbf16, #tpu.memory_space<vmem>>, %arg2: memref<2x64xf32, #tpu.memory_space<vmem>>, %arg3: memref<2x64xf32, #tpu.memory_space<vmem>>, %arg4: memref<8x2x64xf32, #tpu.memory_space<vmem>>, %arg5: memref<2x2x32xf32, #tpu.memory_space<vmem>>, %arg6: memref<2x2x32xf32, #tpu.memory_space<vmem>>) attributes {dimension_semantics = [], scalar_prefetch = 0 : i64, scratch_operands = 0 : i64, tpu.core_type = #tpu.core_type<tc>} {
    %c0 = arith.constant 0 : index
    %c0_0 = arith.constant 0 : index
    %0 = vector.load %arg1[%c0, %c0_0] : memref<64x256xbf16, #tpu.memory_space<vmem>>, vector<64x256xbf16>
    %c0_1 = arith.constant 0 : index
    %c0_2 = arith.constant 0 : index
    %1 = vector.load %arg2[%c0_1, %c0_2] : memref<2x64xf32, #tpu.memory_space<vmem>>, vector<2x32xf32>
    %c0_3 = arith.constant 0 : index
    %c32 = arith.constant 32 : index
    %2 = vector.load %arg2[%c0_3, %c32] : memref<2x64xf32, #tpu.memory_space<vmem>>, vector<2x32xf32>
    %c0_4 = arith.constant 0 : index
    %c0_5 = arith.constant 0 : index
    %3 = vector.load %arg3[%c0_4, %c0_5] : memref<2x64xf32, #tpu.memory_space<vmem>>, vector<2x32xf32>
    %c0_6 = arith.constant 0 : index
    %c32_7 = arith.constant 32 : index
    %4 = vector.load %arg3[%c0_6, %c32_7] : memref<2x64xf32, #tpu.memory_space<vmem>>, vector<2x32xf32>
    %5 = tpu.concatenate %1, %2 in 1 : vector<2x32xf32>, vector<2x32xf32> -> vector<2x64xf32>
    %6 = arith.truncf %5 : vector<2x64xf32> to vector<2x64xbf16>
    %cst = arith.constant dense<0.000000e+00> : vector<2x256xf32>
    %7 = tpu.matmul %6, %0, %cst {dimension_numbers = #tpu.dot_dimension_numbers<[1], [0], [0], [1], [0, 0, 1, 1], [], []>} : vector<2x64xbf16>, vector<64x256xbf16>, vector<2x256xf32> -> vector<2x256xf32>
    %c0_8 = arith.constant 0 : index
    %c0_9 = arith.constant 0 : index
    %c0_10 = arith.constant 0 : index
    %8 = vector.load %arg0[%c0_8, %c0_9, %c0_10] : memref<8x2x256xf32, #tpu.memory_space<vmem>>, vector<1x2x256xf32>
    %9 = vector.shape_cast %8 : vector<1x2x256xf32> to vector<2x256xf32>
    %c7 = arith.constant 7 : index
    %c0_11 = arith.constant 0 : index
    %c0_12 = arith.constant 0 : index
    %10 = vector.load %arg0[%c7, %c0_11, %c0_12] : memref<8x2x256xf32, #tpu.memory_space<vmem>>, vector<1x2x256xf32>
    %11 = vector.shape_cast %10 : vector<1x2x256xf32> to vector<2x256xf32>
    %12 = vector.extract_strided_slice %9 {offsets = [0, 0], sizes = [2, 128], strides = [1, 1]} : vector<2x256xf32> to vector<2x128xf32>
    %13 = vector.extract_strided_slice %7 {offsets = [0, 0], sizes = [2, 128], strides = [1, 1]} : vector<2x256xf32> to vector<2x128xf32>
    %14 = arith.addf %12, %13 : vector<2x128xf32>
    %15 = vector.extract_strided_slice %14 {offsets = [0, 0], sizes = [2, 32], strides = [1, 1]} : vector<2x128xf32> to vector<2x32xf32>
    %16 = arith.negf %15 : vector<2x32xf32>
    %17 = math.exp %16 : vector<2x32xf32>
    %cst_13 = arith.constant 1.000000e+00 : f32
    %18 = vector.broadcast %cst_13 : f32 to vector<2x32xf32>
    %19 = arith.addf %18, %17 : vector<2x32xf32>
    %20 = arith.divf %18, %19 : vector<2x32xf32>
    %21 = vector.extract_strided_slice %14 {offsets = [0, 32], sizes = [2, 32], strides = [1, 1]} : vector<2x128xf32> to vector<2x32xf32>
    %22 = arith.negf %21 : vector<2x32xf32>
    %23 = math.exp %22 : vector<2x32xf32>
    %cst_14 = arith.constant 1.000000e+00 : f32
    %24 = vector.broadcast %cst_14 : f32 to vector<2x32xf32>
    %25 = arith.addf %24, %23 : vector<2x32xf32>
    %26 = arith.divf %24, %25 : vector<2x32xf32>
    %27 = vector.extract_strided_slice %14 {offsets = [0, 64], sizes = [2, 32], strides = [1, 1]} : vector<2x128xf32> to vector<2x32xf32>
    %28 = math.tanh %27 : vector<2x32xf32>
    %29 = vector.extract_strided_slice %14 {offsets = [0, 96], sizes = [2, 32], strides = [1, 1]} : vector<2x128xf32> to vector<2x32xf32>
    %30 = arith.negf %29 : vector<2x32xf32>
    %31 = math.exp %30 : vector<2x32xf32>
    %cst_15 = arith.constant 1.000000e+00 : f32
    %32 = vector.broadcast %cst_15 : f32 to vector<2x32xf32>
    %33 = arith.addf %32, %31 : vector<2x32xf32>
    %34 = arith.divf %32, %33 : vector<2x32xf32>
    %35 = arith.mulf %26, %3 : vector<2x32xf32>
    %36 = arith.mulf %20, %28 : vector<2x32xf32>
    %37 = arith.addf %35, %36 : vector<2x32xf32>
    %38 = math.tanh %37 : vector<2x32xf32>
    %39 = arith.mulf %34, %38 : vector<2x32xf32>
    %40 = vector.extract_strided_slice %11 {offsets = [0, 128], sizes = [2, 128], strides = [1, 1]} : vector<2x256xf32> to vector<2x128xf32>
    %41 = vector.extract_strided_slice %7 {offsets = [0, 128], sizes = [2, 128], strides = [1, 1]} : vector<2x256xf32> to vector<2x128xf32>
    %42 = arith.addf %40, %41 : vector<2x128xf32>
    %43 = vector.extract_strided_slice %42 {offsets = [0, 0], sizes = [2, 32], strides = [1, 1]} : vector<2x128xf32> to vector<2x32xf32>
    %44 = arith.negf %43 : vector<2x32xf32>
    %45 = math.exp %44 : vector<2x32xf32>
    %cst_16 = arith.constant 1.000000e+00 : f32
    %46 = vector.broadcast %cst_16 : f32 to vector<2x32xf32>
    %47 = arith.addf %46, %45 : vector<2x32xf32>
    %48 = arith.divf %46, %47 : vector<2x32xf32>
    %49 = vector.extract_strided_slice %42 {offsets = [0, 32], sizes = [2, 32], strides = [1, 1]} : vector<2x128xf32> to vector<2x32xf32>
    %50 = arith.negf %49 : vector<2x32xf32>
    %51 = math.exp %50 : vector<2x32xf32>
    %cst_17 = arith.constant 1.000000e+00 : f32
    %52 = vector.broadcast %cst_17 : f32 to vector<2x32xf32>
    %53 = arith.addf %52, %51 : vector<2x32xf32>
    %54 = arith.divf %52, %53 : vector<2x32xf32>
    %55 = vector.extract_strided_slice %42 {offsets = [0, 64], sizes = [2, 32], strides = [1, 1]} : vector<2x128xf32> to vector<2x32xf32>
    %56 = math.tanh %55 : vector<2x32xf32>
    %57 = vector.extract_strided_slice %42 {offsets = [0, 96], sizes = [2, 32], strides = [1, 1]} : vector<2x128xf32> to vector<2x32xf32>
    %58 = arith.negf %57 : vector<2x32xf32>
    %59 = math.exp %58 : vector<2x32xf32>
    %cst_18 = arith.constant 1.000000e+00 : f32
    %60 = vector.broadcast %cst_18 : f32 to vector<2x32xf32>
    %61 = arith.addf %60, %59 : vector<2x32xf32>
    %62 = arith.divf %60, %61 : vector<2x32xf32>
    %63 = arith.mulf %54, %4 : vector<2x32xf32>
    %64 = arith.mulf %48, %56 : vector<2x32xf32>
    %65 = arith.addf %63, %64 : vector<2x32xf32>
    %66 = math.tanh %65 : vector<2x32xf32>
    %67 = arith.mulf %62, %66 : vector<2x32xf32>
    %c0_19 = arith.constant 0 : index
    %c0_20 = arith.constant 0 : index
    %c0_21 = arith.constant 0 : index
    %68 = vector.load %arg4[%c0_19, %c0_20, %c0_21] : memref<8x2x64xf32, #tpu.memory_space<vmem>>, vector<1x2x32xf32>
    %69 = vector.shape_cast %68 : vector<1x2x32xf32> to vector<2x32xf32>
    %70 = vector.shape_cast %39 : vector<2x32xf32> to vector<1x2x32xf32>
    tpu.vector_store %arg4[%c0_19, %c0_20, %c0_21], %70 {strides = array<i32>} : memref<8x2x64xf32, #tpu.memory_space<vmem>>, vector<1x2x32xf32>,
    %c7_22 = arith.constant 7 : index
    %c0_23 = arith.constant 0 : index
    %c32_24 = arith.constant 32 : index
    %71 = vector.load %arg4[%c7_22, %c0_23, %c32_24] : memref<8x2x64xf32, #tpu.memory_space<vmem>>, vector<1x2x32xf32>
    %72 = vector.shape_cast %71 : vector<1x2x32xf32> to vector<2x32xf32>
    %73 = vector.shape_cast %67 : vector<2x32xf32> to vector<1x2x32xf32>
    tpu.vector_store %arg4[%c7_22, %c0_23, %c32_24], %73 {strides = array<i32>} : memref<8x2x64xf32, #tpu.memory_space<vmem>>, vector<1x2x32xf32>,
    %74 = tpu.concatenate %39, %67 in 1 : vector<2x32xf32>, vector<2x32xf32> -> vector<2x64xf32>
    %75 = arith.truncf %74 : vector<2x64xf32> to vector<2x64xbf16>
    %cst_25 = arith.constant dense<0.000000e+00> : vector<2x256xf32>
    %76 = tpu.matmul %75, %0, %cst_25 {dimension_numbers = #tpu.dot_dimension_numbers<[1], [0], [0], [1], [0, 0, 1, 1], [], []>} : vector<2x64xbf16>, vector<64x256xbf16>, vector<2x256xf32> -> vector<2x256xf32>
    %c1 = arith.constant 1 : index
    %c0_26 = arith.constant 0 : index
    %c0_27 = arith.constant 0 : index
    %77 = vector.load %arg0[%c1, %c0_26, %c0_27] : memref<8x2x256xf32, #tpu.memory_space<vmem>>, vector<1x2x256xf32>
    %78 = vector.shape_cast %77 : vector<1x2x256xf32> to vector<2x256xf32>
    %c6 = arith.constant 6 : index
    %c0_28 = arith.constant 0 : index
    %c0_29 = arith.constant 0 : index
    %79 = vector.load %arg0[%c6, %c0_28, %c0_29] : memref<8x2x256xf32, #tpu.memory_space<vmem>>, vector<1x2x256xf32>
    %80 = vector.shape_cast %79 : vector<1x2x256xf32> to vector<2x256xf32>
    %81 = vector.extract_strided_slice %78 {offsets = [0, 0], sizes = [2, 128], strides = [1, 1]} : vector<2x256xf32> to vector<2x128xf32>
    %82 = vector.extract_strided_slice %76 {offsets = [0, 0], sizes = [2, 128], strides = [1, 1]} : vector<2x256xf32> to vector<2x128xf32>
    %83 = arith.addf %81, %82 : vector<2x128xf32>
    %84 = vector.extract_strided_slice %83 {offsets = [0, 0], sizes = [2, 32], strides = [1, 1]} : vector<2x128xf32> to vector<2x32xf32>
    %85 = arith.negf %84 : vector<2x32xf32>
    %86 = math.exp %85 : vector<2x32xf32>
    %cst_30 = arith.constant 1.000000e+00 : f32
    %87 = vector.broadcast %cst_30 : f32 to vector<2x32xf32>
    %88 = arith.addf %87, %86 : vector<2x32xf32>
    %89 = arith.divf %87, %88 : vector<2x32xf32>
    %90 = vector.extract_strided_slice %83 {offsets = [0, 32], sizes = [2, 32], strides = [1, 1]} : vector<2x128xf32> to vector<2x32xf32>
    %91 = arith.negf %90 : vector<2x32xf32>
    %92 = math.exp %91 : vector<2x32xf32>
    %cst_31 = arith.constant 1.000000e+00 : f32
    %93 = vector.broadcast %cst_31 : f32 to vector<2x32xf32>
    %94 = arith.addf %93, %92 : vector<2x32xf32>
    %95 = arith.divf %93, %94 : vector<2x32xf32>
    %96 = vector.extract_strided_slice %83 {offsets = [0, 64], sizes = [2, 32], strides = [1, 1]} : vector<2x128xf32> to vector<2x32xf32>
    %97 = math.tanh %96 : vector<2x32xf32>
    %98 = vector.extract_strided_slice %83 {offsets = [0, 96], sizes = [2, 32], strides = [1, 1]} : vector<2x128xf32> to vector<2x32xf32>
    %99 = arith.negf %98 : vector<2x32xf32>
    %100 = math.exp %99 : vector<2x32xf32>
    %cst_32 = arith.constant 1.000000e+00 : f32
    %101 = vector.broadcast %cst_32 : f32 to vector<2x32xf32>
    %102 = arith.addf %101, %100 : vector<2x32xf32>
    %103 = arith.divf %101, %102 : vector<2x32xf32>
    %104 = arith.mulf %95, %37 : vector<2x32xf32>
    %105 = arith.mulf %89, %97 : vector<2x32xf32>
    %106 = arith.addf %104, %105 : vector<2x32xf32>
    %107 = math.tanh %106 : vector<2x32xf32>
    %108 = arith.mulf %103, %107 : vector<2x32xf32>
    %109 = vector.extract_strided_slice %80 {offsets = [0, 128], sizes = [2, 128], strides = [1, 1]} : vector<2x256xf32> to vector<2x128xf32>
    %110 = vector.extract_strided_slice %76 {offsets = [0, 128], sizes = [2, 128], strides = [1, 1]} : vector<2x256xf32> to vector<2x128xf32>
    %111 = arith.addf %109, %110 : vector<2x128xf32>
    %112 = vector.extract_strided_slice %111 {offsets = [0, 0], sizes = [2, 32], strides = [1, 1]} : vector<2x128xf32> to vector<2x32xf32>
    %113 = arith.negf %112 : vector<2x32xf32>
    %114 = math.exp %113 : vector<2x32xf32>
    %cst_33 = arith.constant 1.000000e+00 : f32
    %115 = vector.broadcast %cst_33 : f32 to vector<2x32xf32>
    %116 = arith.addf %115, %114 : vector<2x32xf32>
    %117 = arith.divf %115, %116 : vector<2x32xf32>
    %118 = vector.extract_strided_slice %111 {offsets = [0, 32], sizes = [2, 32], strides = [1, 1]} : vector<2x128xf32> to vector<2x32xf32>
    %119 = arith.negf %118 : vector<2x32xf32>
    %120 = math.exp %119 : vector<2x32xf32>
    %cst_34 = arith.constant 1.000000e+00 : f32
    %121 = vector.broadcast %cst_34 : f32 to vector<2x32xf32>
    %122 = arith.addf %121, %120 : vector<2x32xf32>
    %123 = arith.divf %121, %122 : vector<2x32xf32>
    %124 = vector.extract_strided_slice %111 {offsets = [0, 64], sizes = [2, 32], strides = [1, 1]} : vector<2x128xf32> to vector<2x32xf32>
    %125 = math.tanh %124 : vector<2x32xf32>
    %126 = vector.extract_strided_slice %111 {offsets = [0, 96], sizes = [2, 32], strides = [1, 1]} : vector<2x128xf32> to vector<2x32xf32>
    %127 = arith.negf %126 : vector<2x32xf32>
    %128 = math.exp %127 : vector<2x32xf32>
    %cst_35 = arith.constant 1.000000e+00 : f32
    %129 = vector.broadcast %cst_35 : f32 to vector<2x32xf32>
    %130 = arith.addf %129, %128 : vector<2x32xf32>
    %131 = arith.divf %129, %130 : vector<2x32xf32>
    %132 = arith.mulf %123, %65 : vector<2x32xf32>
    %133 = arith.mulf %117, %125 : vector<2x32xf32>
    %134 = arith.addf %132, %133 : vector<2x32xf32>
    %135 = math.tanh %134 : vector<2x32xf32>
    %136 = arith.mulf %131, %135 : vector<2x32xf32>
    %c1_36 = arith.constant 1 : index
    %c0_37 = arith.constant 0 : index
    %c0_38 = arith.constant 0 : index
    %137 = vector.load %arg4[%c1_36, %c0_37, %c0_38] : memref<8x2x64xf32, #tpu.memory_space<vmem>>, vector<1x2x32xf32>
    %138 = vector.shape_cast %137 : vector<1x2x32xf32> to vector<2x32xf32>
    %139 = vector.shape_cast %108 : vector<2x32xf32> to vector<1x2x32xf32>
    tpu.vector_store %arg4[%c1_36, %c0_37, %c0_38], %139 {strides = array<i32>} : memref<8x2x64xf32, #tpu.memory_space<vmem>>, vector<1x2x32xf32>,
    %c6_39 = arith.constant 6 : index
    %c0_40 = arith.constant 0 : index
    %c32_41 = arith.constant 32 : index
    %140 = vector.load %arg4[%c6_39, %c0_40, %c32_41] : memref<8x2x64xf32, #tpu.memory_space<vmem>>, vector<1x2x32xf32>
    %141 = vector.shape_cast %140 : vector<1x2x32xf32> to vector<2x32xf32>
    %142 = vector.shape_cast %136 : vector<2x32xf32> to vector<1x2x32xf32>
    tpu.vector_store %arg4[%c6_39, %c0_40, %c32_41], %142 {strides = array<i32>} : memref<8x2x64xf32, #tpu.memory_space<vmem>>, vector<1x2x32xf32>,
    %143 = tpu.concatenate %108, %136 in 1 : vector<2x32xf32>, vector<2x32xf32> -> vector<2x64xf32>
    %144 = arith.truncf %143 : vector<2x64xf32> to vector<2x64xbf16>
    %cst_42 = arith.constant dense<0.000000e+00> : vector<2x256xf32>
    %145 = tpu.matmul %144, %0, %cst_42 {dimension_numbers = #tpu.dot_dimension_numbers<[1], [0], [0], [1], [0, 0, 1, 1], [], []>} : vector<2x64xbf16>, vector<64x256xbf16>, vector<2x256xf32> -> vector<2x256xf32>
    %c2 = arith.constant 2 : index
    %c0_43 = arith.constant 0 : index
    %c0_44 = arith.constant 0 : index
    %146 = vector.load %arg0[%c2, %c0_43, %c0_44] : memref<8x2x256xf32, #tpu.memory_space<vmem>>, vector<1x2x256xf32>
    %147 = vector.shape_cast %146 : vector<1x2x256xf32> to vector<2x256xf32>
    %c5 = arith.constant 5 : index
    %c0_45 = arith.constant 0 : index
    %c0_46 = arith.constant 0 : index
    %148 = vector.load %arg0[%c5, %c0_45, %c0_46] : memref<8x2x256xf32, #tpu.memory_space<vmem>>, vector<1x2x256xf32>
    %149 = vector.shape_cast %148 : vector<1x2x256xf32> to vector<2x256xf32>
    %150 = vector.extract_strided_slice %147 {offsets = [0, 0], sizes = [2, 128], strides = [1, 1]} : vector<2x256xf32> to vector<2x128xf32>
    %151 = vector.extract_strided_slice %145 {offsets = [0, 0], sizes = [2, 128], strides = [1, 1]} : vector<2x256xf32> to vector<2x128xf32>
    %152 = arith.addf %150, %151 : vector<2x128xf32>
    %153 = vector.extract_strided_slice %152 {offsets = [0, 0], sizes = [2, 32], strides = [1, 1]} : vector<2x128xf32> to vector<2x32xf32>
    %154 = arith.negf %153 : vector<2x32xf32>
    %155 = math.exp %154 : vector<2x32xf32>
    %cst_47 = arith.constant 1.000000e+00 : f32
    %156 = vector.broadcast %cst_47 : f32 to vector<2x32xf32>
    %157 = arith.addf %156, %155 : vector<2x32xf32>
    %158 = arith.divf %156, %157 : vector<2x32xf32>
    %159 = vector.extract_strided_slice %152 {offsets = [0, 32], sizes = [2, 32], strides = [1, 1]} : vector<2x128xf32> to vector<2x32xf32>
    %160 = arith.negf %159 : vector<2x32xf32>
    %161 = math.exp %160 : vector<2x32xf32>
    %cst_48 = arith.constant 1.000000e+00 : f32
    %162 = vector.broadcast %cst_48 : f32 to vector<2x32xf32>
    %163 = arith.addf %162, %161 : vector<2x32xf32>
    %164 = arith.divf %162, %163 : vector<2x32xf32>
    %165 = vector.extract_strided_slice %152 {offsets = [0, 64], sizes = [2, 32], strides = [1, 1]} : vector<2x128xf32> to vector<2x32xf32>
    %166 = math.tanh %165 : vector<2x32xf32>
    %167 = vector.extract_strided_slice %152 {offsets = [0, 96], sizes = [2, 32], strides = [1, 1]} : vector<2x128xf32> to vector<2x32xf32>
    %168 = arith.negf %167 : vector<2x32xf32>
    %169 = math.exp %168 : vector<2x32xf32>
    %cst_49 = arith.constant 1.000000e+00 : f32
    %170 = vector.broadcast %cst_49 : f32 to vector<2x32xf32>
    %171 = arith.addf %170, %169 : vector<2x32xf32>
    %172 = arith.divf %170, %171 : vector<2x32xf32>
    %173 = arith.mulf %164, %106 : vector<2x32xf32>
    %174 = arith.mulf %158, %166 : vector<2x32xf32>
    %175 = arith.addf %173, %174 : vector<2x32xf32>
    %176 = math.tanh %175 : vector<2x32xf32>
    %177 = arith.mulf %172, %176 : vector<2x32xf32>
    %178 = vector.extract_strided_slice %149 {offsets = [0, 128], sizes = [2, 128], strides = [1, 1]} : vector<2x256xf32> to vector<2x128xf32>
    %179 = vector.extract_strided_slice %145 {offsets = [0, 128], sizes = [2, 128], strides = [1, 1]} : vector<2x256xf32> to vector<2x128xf32>
    %180 = arith.addf %178, %179 : vector<2x128xf32>
    %181 = vector.extract_strided_slice %180 {offsets = [0, 0], sizes = [2, 32], strides = [1, 1]} : vector<2x128xf32> to vector<2x32xf32>
    %182 = arith.negf %181 : vector<2x32xf32>
    %183 = math.exp %182 : vector<2x32xf32>
    %cst_50 = arith.constant 1.000000e+00 : f32
    %184 = vector.broadcast %cst_50 : f32 to vector<2x32xf32>
    %185 = arith.addf %184, %183 : vector<2x32xf32>
    %186 = arith.divf %184, %185 : vector<2x32xf32>
    %187 = vector.extract_strided_slice %180 {offsets = [0, 32], sizes = [2, 32], strides = [1, 1]} : vector<2x128xf32> to vector<2x32xf32>
    %188 = arith.negf %187 : vector<2x32xf32>
    %189 = math.exp %188 : vector<2x32xf32>
    %cst_51 = arith.constant 1.000000e+00 : f32
    %190 = vector.broadcast %cst_51 : f32 to vector<2x32xf32>
    %191 = arith.addf %190, %189 : vector<2x32xf32>
    %192 = arith.divf %190, %191 : vector<2x32xf32>
    %193 = vector.extract_strided_slice %180 {offsets = [0, 64], sizes = [2, 32], strides = [1, 1]} : vector<2x128xf32> to vector<2x32xf32>
    %194 = math.tanh %193 : vector<2x32xf32>
    %195 = vector.extract_strided_slice %180 {offsets = [0, 96], sizes = [2, 32], strides = [1, 1]} : vector<2x128xf32> to vector<2x32xf32>
    %196 = arith.negf %195 : vector<2x32xf32>
    %197 = math.exp %196 : vector<2x32xf32>
    %cst_52 = arith.constant 1.000000e+00 : f32
    %198 = vector.broadcast %cst_52 : f32 to vector<2x32xf32>
    %199 = arith.addf %198, %197 : vector<2x32xf32>
    %200 = arith.divf %198, %199 : vector<2x32xf32>
    %201 = arith.mulf %192, %134 : vector<2x32xf32>
    %202 = arith.mulf %186, %194 : vector<2x32xf32>
    %203 = arith.addf %201, %202 : vector<2x32xf32>
    %204 = math.tanh %203 : vector<2x32xf32>
    %205 = arith.mulf %200, %204 : vector<2x32xf32>
    %c2_53 = arith.constant 2 : index
    %c0_54 = arith.constant 0 : index
    %c0_55 = arith.constant 0 : index
    %206 = vector.load %arg4[%c2_53, %c0_54, %c0_55] : memref<8x2x64xf32, #tpu.memory_space<vmem>>, vector<1x2x32xf32>
    %207 = vector.shape_cast %206 : vector<1x2x32xf32> to vector<2x32xf32>
    %208 = vector.shape_cast %177 : vector<2x32xf32> to vector<1x2x32xf32>
    tpu.vector_store %arg4[%c2_53, %c0_54, %c0_55], %208 {strides = array<i32>} : memref<8x2x64xf32, #tpu.memory_space<vmem>>, vector<1x2x32xf32>,
    %c5_56 = arith.constant 5 : index
    %c0_57 = arith.constant 0 : index
    %c32_58 = arith.constant 32 : index
    %209 = vector.load %arg4[%c5_56, %c0_57, %c32_58] : memref<8x2x64xf32, #tpu.memory_space<vmem>>, vector<1x2x32xf32>
    %210 = vector.shape_cast %209 : vector<1x2x32xf32> to vector<2x32xf32>
    %211 = vector.shape_cast %205 : vector<2x32xf32> to vector<1x2x32xf32>
    tpu.vector_store %arg4[%c5_56, %c0_57, %c32_58], %211 {strides = array<i32>} : memref<8x2x64xf32, #tpu.memory_space<vmem>>, vector<1x2x32xf32>,
    %212 = tpu.concatenate %177, %205 in 1 : vector<2x32xf32>, vector<2x32xf32> -> vector<2x64xf32>
    %213 = arith.truncf %212 : vector<2x64xf32> to vector<2x64xbf16>
    %cst_59 = arith.constant dense<0.000000e+00> : vector<2x256xf32>
    %214 = tpu.matmul %213, %0, %cst_59 {dimension_numbers = #tpu.dot_dimension_numbers<[1], [0], [0], [1], [0, 0, 1, 1], [], []>} : vector<2x64xbf16>, vector<64x256xbf16>, vector<2x256xf32> -> vector<2x256xf32>
    %c3 = arith.constant 3 : index
    %c0_60 = arith.constant 0 : index
    %c0_61 = arith.constant 0 : index
    %215 = vector.load %arg0[%c3, %c0_60, %c0_61] : memref<8x2x256xf32, #tpu.memory_space<vmem>>, vector<1x2x256xf32>
    %216 = vector.shape_cast %215 : vector<1x2x256xf32> to vector<2x256xf32>
    %c4 = arith.constant 4 : index
    %c0_62 = arith.constant 0 : index
    %c0_63 = arith.constant 0 : index
    %217 = vector.load %arg0[%c4, %c0_62, %c0_63] : memref<8x2x256xf32, #tpu.memory_space<vmem>>, vector<1x2x256xf32>
    %218 = vector.shape_cast %217 : vector<1x2x256xf32> to vector<2x256xf32>
    %219 = vector.extract_strided_slice %216 {offsets = [0, 0], sizes = [2, 128], strides = [1, 1]} : vector<2x256xf32> to vector<2x128xf32>
    %220 = vector.extract_strided_slice %214 {offsets = [0, 0], sizes = [2, 128], strides = [1, 1]} : vector<2x256xf32> to vector<2x128xf32>
    %221 = arith.addf %219, %220 : vector<2x128xf32>
    %222 = vector.extract_strided_slice %221 {offsets = [0, 0], sizes = [2, 32], strides = [1, 1]} : vector<2x128xf32> to vector<2x32xf32>
    %223 = arith.negf %222 : vector<2x32xf32>
    %224 = math.exp %223 : vector<2x32xf32>
    %cst_64 = arith.constant 1.000000e+00 : f32
    %225 = vector.broadcast %cst_64 : f32 to vector<2x32xf32>
    %226 = arith.addf %225, %224 : vector<2x32xf32>
    %227 = arith.divf %225, %226 : vector<2x32xf32>
    %228 = vector.extract_strided_slice %221 {offsets = [0, 32], sizes = [2, 32], strides = [1, 1]} : vector<2x128xf32> to vector<2x32xf32>
    %229 = arith.negf %228 : vector<2x32xf32>
    %230 = math.exp %229 : vector<2x32xf32>
    %cst_65 = arith.constant 1.000000e+00 : f32
    %231 = vector.broadcast %cst_65 : f32 to vector<2x32xf32>
    %232 = arith.addf %231, %230 : vector<2x32xf32>
    %233 = arith.divf %231, %232 : vector<2x32xf32>
    %234 = vector.extract_strided_slice %221 {offsets = [0, 64], sizes = [2, 32], strides = [1, 1]} : vector<2x128xf32> to vector<2x32xf32>
    %235 = math.tanh %234 : vector<2x32xf32>
    %236 = vector.extract_strided_slice %221 {offsets = [0, 96], sizes = [2, 32], strides = [1, 1]} : vector<2x128xf32> to vector<2x32xf32>
    %237 = arith.negf %236 : vector<2x32xf32>
    %238 = math.exp %237 : vector<2x32xf32>
    %cst_66 = arith.constant 1.000000e+00 : f32
    %239 = vector.broadcast %cst_66 : f32 to vector<2x32xf32>
    %240 = arith.addf %239, %238 : vector<2x32xf32>
    %241 = arith.divf %239, %240 : vector<2x32xf32>
    %242 = arith.mulf %233, %175 : vector<2x32xf32>
    %243 = arith.mulf %227, %235 : vector<2x32xf32>
    %244 = arith.addf %242, %243 : vector<2x32xf32>
    %245 = math.tanh %244 : vector<2x32xf32>
    %246 = arith.mulf %241, %245 : vector<2x32xf32>
    %247 = vector.extract_strided_slice %218 {offsets = [0, 128], sizes = [2, 128], strides = [1, 1]} : vector<2x256xf32> to vector<2x128xf32>
    %248 = vector.extract_strided_slice %214 {offsets = [0, 128], sizes = [2, 128], strides = [1, 1]} : vector<2x256xf32> to vector<2x128xf32>
    %249 = arith.addf %247, %248 : vector<2x128xf32>
    %250 = vector.extract_strided_slice %249 {offsets = [0, 0], sizes = [2, 32], strides = [1, 1]} : vector<2x128xf32> to vector<2x32xf32>
    %251 = arith.negf %250 : vector<2x32xf32>
    %252 = math.exp %251 : vector<2x32xf32>
    %cst_67 = arith.constant 1.000000e+00 : f32
    %253 = vector.broadcast %cst_67 : f32 to vector<2x32xf32>
    %254 = arith.addf %253, %252 : vector<2x32xf32>
    %255 = arith.divf %253, %254 : vector<2x32xf32>
    %256 = vector.extract_strided_slice %249 {offsets = [0, 32], sizes = [2, 32], strides = [1, 1]} : vector<2x128xf32> to vector<2x32xf32>
    %257 = arith.negf %256 : vector<2x32xf32>
    %258 = math.exp %257 : vector<2x32xf32>
    %cst_68 = arith.constant 1.000000e+00 : f32
    %259 = vector.broadcast %cst_68 : f32 to vector<2x32xf32>
    %260 = arith.addf %259, %258 : vector<2x32xf32>
    %261 = arith.divf %259, %260 : vector<2x32xf32>
    %262 = vector.extract_strided_slice %249 {offsets = [0, 64], sizes = [2, 32], strides = [1, 1]} : vector<2x128xf32> to vector<2x32xf32>
    %263 = math.tanh %262 : vector<2x32xf32>
    %264 = vector.extract_strided_slice %249 {offsets = [0, 96], sizes = [2, 32], strides = [1, 1]} : vector<2x128xf32> to vector<2x32xf32>
    %265 = arith.negf %264 : vector<2x32xf32>
    %266 = math.exp %265 : vector<2x32xf32>
    %cst_69 = arith.constant 1.000000e+00 : f32
    %267 = vector.broadcast %cst_69 : f32 to vector<2x32xf32>
    %268 = arith.addf %267, %266 : vector<2x32xf32>
    %269 = arith.divf %267, %268 : vector<2x32xf32>
    %270 = arith.mulf %261, %203 : vector<2x32xf32>
    %271 = arith.mulf %255, %263 : vector<2x32xf32>
    %272 = arith.addf %270, %271 : vector<2x32xf32>
    %273 = math.tanh %272 : vector<2x32xf32>
    %274 = arith.mulf %269, %273 : vector<2x32xf32>
    %c3_70 = arith.constant 3 : index
    %c0_71 = arith.constant 0 : index
    %c0_72 = arith.constant 0 : index
    %275 = vector.load %arg4[%c3_70, %c0_71, %c0_72] : memref<8x2x64xf32, #tpu.memory_space<vmem>>, vector<1x2x32xf32>
    %276 = vector.shape_cast %275 : vector<1x2x32xf32> to vector<2x32xf32>
    %277 = vector.shape_cast %246 : vector<2x32xf32> to vector<1x2x32xf32>
    tpu.vector_store %arg4[%c3_70, %c0_71, %c0_72], %277 {strides = array<i32>} : memref<8x2x64xf32, #tpu.memory_space<vmem>>, vector<1x2x32xf32>,
    %c4_73 = arith.constant 4 : index
    %c0_74 = arith.constant 0 : index
    %c32_75 = arith.constant 32 : index
    %278 = vector.load %arg4[%c4_73, %c0_74, %c32_75] : memref<8x2x64xf32, #tpu.memory_space<vmem>>, vector<1x2x32xf32>
    %279 = vector.shape_cast %278 : vector<1x2x32xf32> to vector<2x32xf32>
    %280 = vector.shape_cast %274 : vector<2x32xf32> to vector<1x2x32xf32>
    tpu.vector_store %arg4[%c4_73, %c0_74, %c32_75], %280 {strides = array<i32>} : memref<8x2x64xf32, #tpu.memory_space<vmem>>, vector<1x2x32xf32>,
    %281 = tpu.concatenate %246, %274 in 1 : vector<2x32xf32>, vector<2x32xf32> -> vector<2x64xf32>
    %282 = arith.truncf %281 : vector<2x64xf32> to vector<2x64xbf16>
    %cst_76 = arith.constant dense<0.000000e+00> : vector<2x256xf32>
    %283 = tpu.matmul %282, %0, %cst_76 {dimension_numbers = #tpu.dot_dimension_numbers<[1], [0], [0], [1], [0, 0, 1, 1], [], []>} : vector<2x64xbf16>, vector<64x256xbf16>, vector<2x256xf32> -> vector<2x256xf32>
    %c4_77 = arith.constant 4 : index
    %c0_78 = arith.constant 0 : index
    %c0_79 = arith.constant 0 : index
    %284 = vector.load %arg0[%c4_77, %c0_78, %c0_79] : memref<8x2x256xf32, #tpu.memory_space<vmem>>, vector<1x2x256xf32>
    %285 = vector.shape_cast %284 : vector<1x2x256xf32> to vector<2x256xf32>
    %c3_80 = arith.constant 3 : index
    %c0_81 = arith.constant 0 : index
    %c0_82 = arith.constant 0 : index
    %286 = vector.load %arg0[%c3_80, %c0_81, %c0_82] : memref<8x2x256xf32, #tpu.memory_space<vmem>>, vector<1x2x256xf32>
    %287 = vector.shape_cast %286 : vector<1x2x256xf32> to vector<2x256xf32>
    %288 = vector.extract_strided_slice %285 {offsets = [0, 0], sizes = [2, 128], strides = [1, 1]} : vector<2x256xf32> to vector<2x128xf32>
    %289 = vector.extract_strided_slice %283 {offsets = [0, 0], sizes = [2, 128], strides = [1, 1]} : vector<2x256xf32> to vector<2x128xf32>
    %290 = arith.addf %288, %289 : vector<2x128xf32>
    %291 = vector.extract_strided_slice %290 {offsets = [0, 0], sizes = [2, 32], strides = [1, 1]} : vector<2x128xf32> to vector<2x32xf32>
    %292 = arith.negf %291 : vector<2x32xf32>
    %293 = math.exp %292 : vector<2x32xf32>
    %cst_83 = arith.constant 1.000000e+00 : f32
    %294 = vector.broadcast %cst_83 : f32 to vector<2x32xf32>
    %295 = arith.addf %294, %293 : vector<2x32xf32>
    %296 = arith.divf %294, %295 : vector<2x32xf32>
    %297 = vector.extract_strided_slice %290 {offsets = [0, 32], sizes = [2, 32], strides = [1, 1]} : vector<2x128xf32> to vector<2x32xf32>
    %298 = arith.negf %297 : vector<2x32xf32>
    %299 = math.exp %298 : vector<2x32xf32>
    %cst_84 = arith.constant 1.000000e+00 : f32
    %300 = vector.broadcast %cst_84 : f32 to vector<2x32xf32>
    %301 = arith.addf %300, %299 : vector<2x32xf32>
    %302 = arith.divf %300, %301 : vector<2x32xf32>
    %303 = vector.extract_strided_slice %290 {offsets = [0, 64], sizes = [2, 32], strides = [1, 1]} : vector<2x128xf32> to vector<2x32xf32>
    %304 = math.tanh %303 : vector<2x32xf32>
    %305 = vector.extract_strided_slice %290 {offsets = [0, 96], sizes = [2, 32], strides = [1, 1]} : vector<2x128xf32> to vector<2x32xf32>
    %306 = arith.negf %305 : vector<2x32xf32>
    %307 = math.exp %306 : vector<2x32xf32>
    %cst_85 = arith.constant 1.000000e+00 : f32
    %308 = vector.broadcast %cst_85 : f32 to vector<2x32xf32>
    %309 = arith.addf %308, %307 : vector<2x32xf32>
    %310 = arith.divf %308, %309 : vector<2x32xf32>
    %311 = arith.mulf %302, %244 : vector<2x32xf32>
    %312 = arith.mulf %296, %304 : vector<2x32xf32>
    %313 = arith.addf %311, %312 : vector<2x32xf32>
    %314 = math.tanh %313 : vector<2x32xf32>
    %315 = arith.mulf %310, %314 : vector<2x32xf32>
    %316 = vector.extract_strided_slice %287 {offsets = [0, 128], sizes = [2, 128], strides = [1, 1]} : vector<2x256xf32> to vector<2x128xf32>
    %317 = vector.extract_strided_slice %283 {offsets = [0, 128], sizes = [2, 128], strides = [1, 1]} : vector<2x256xf32> to vector<2x128xf32>
    %318 = arith.addf %316, %317 : vector<2x128xf32>
    %319 = vector.extract_strided_slice %318 {offsets = [0, 0], sizes = [2, 32], strides = [1, 1]} : vector<2x128xf32> to vector<2x32xf32>
    %320 = arith.negf %319 : vector<2x32xf32>
    %321 = math.exp %320 : vector<2x32xf32>
    %cst_86 = arith.constant 1.000000e+00 : f32
    %322 = vector.broadcast %cst_86 : f32 to vector<2x32xf32>
    %323 = arith.addf %322, %321 : vector<2x32xf32>
    %324 = arith.divf %322, %323 : vector<2x32xf32>
    %325 = vector.extract_strided_slice %318 {offsets = [0, 32], sizes = [2, 32], strides = [1, 1]} : vector<2x128xf32> to vector<2x32xf32>
    %326 = arith.negf %325 : vector<2x32xf32>
    %327 = math.exp %326 : vector<2x32xf32>
    %cst_87 = arith.constant 1.000000e+00 : f32
    %328 = vector.broadcast %cst_87 : f32 to vector<2x32xf32>
    %329 = arith.addf %328, %327 : vector<2x32xf32>
    %330 = arith.divf %328, %329 : vector<2x32xf32>
    %331 = vector.extract_strided_slice %318 {offsets = [0, 64], sizes = [2, 32], strides = [1, 1]} : vector<2x128xf32> to vector<2x32xf32>
    %332 = math.tanh %331 : vector<2x32xf32>
    %333 = vector.extract_strided_slice %318 {offsets = [0, 96], sizes = [2, 32], strides = [1, 1]} : vector<2x128xf32> to vector<2x32xf32>
    %334 = arith.negf %333 : vector<2x32xf32>
    %335 = math.exp %334 : vector<2x32xf32>
    %cst_88 = arith.constant 1.000000e+00 : f32
    %336 = vector.broadcast %cst_88 : f32 to vector<2x32xf32>
    %337 = arith.addf %336, %335 : vector<2x32xf32>
    %338 = arith.divf %336, %337 : vector<2x32xf32>
    %339 = arith.mulf %330, %272 : vector<2x32xf32>
    %340 = arith.mulf %324, %332 : vector<2x32xf32>
    %341 = arith.addf %339, %340 : vector<2x32xf32>
    %342 = math.tanh %341 : vector<2x32xf32>
    %343 = arith.mulf %338, %342 : vector<2x32xf32>
    %c4_89 = arith.constant 4 : index
    %c0_90 = arith.constant 0 : index
    %c0_91 = arith.constant 0 : index
    %344 = vector.load %arg4[%c4_89, %c0_90, %c0_91] : memref<8x2x64xf32, #tpu.memory_space<vmem>>, vector<1x2x32xf32>
    %345 = vector.shape_cast %344 : vector<1x2x32xf32> to vector<2x32xf32>
    %346 = vector.shape_cast %315 : vector<2x32xf32> to vector<1x2x32xf32>
    tpu.vector_store %arg4[%c4_89, %c0_90, %c0_91], %346 {strides = array<i32>} : memref<8x2x64xf32, #tpu.memory_space<vmem>>, vector<1x2x32xf32>,
    %c3_92 = arith.constant 3 : index
    %c0_93 = arith.constant 0 : index
    %c32_94 = arith.constant 32 : index
    %347 = vector.load %arg4[%c3_92, %c0_93, %c32_94] : memref<8x2x64xf32, #tpu.memory_space<vmem>>, vector<1x2x32xf32>
    %348 = vector.shape_cast %347 : vector<1x2x32xf32> to vector<2x32xf32>
    %349 = vector.shape_cast %343 : vector<2x32xf32> to vector<1x2x32xf32>
    tpu.vector_store %arg4[%c3_92, %c0_93, %c32_94], %349 {strides = array<i32>} : memref<8x2x64xf32, #tpu.memory_space<vmem>>, vector<1x2x32xf32>,
    %350 = tpu.concatenate %315, %343 in 1 : vector<2x32xf32>, vector<2x32xf32> -> vector<2x64xf32>
    %351 = arith.truncf %350 : vector<2x64xf32> to vector<2x64xbf16>
    %cst_95 = arith.constant dense<0.000000e+00> : vector<2x256xf32>
    %352 = tpu.matmul %351, %0, %cst_95 {dimension_numbers = #tpu.dot_dimension_numbers<[1], [0], [0], [1], [0, 0, 1, 1], [], []>} : vector<2x64xbf16>, vector<64x256xbf16>, vector<2x256xf32> -> vector<2x256xf32>
    %c5_96 = arith.constant 5 : index
    %c0_97 = arith.constant 0 : index
    %c0_98 = arith.constant 0 : index
    %353 = vector.load %arg0[%c5_96, %c0_97, %c0_98] : memref<8x2x256xf32, #tpu.memory_space<vmem>>, vector<1x2x256xf32>
    %354 = vector.shape_cast %353 : vector<1x2x256xf32> to vector<2x256xf32>
    %c2_99 = arith.constant 2 : index
    %c0_100 = arith.constant 0 : index
    %c0_101 = arith.constant 0 : index
    %355 = vector.load %arg0[%c2_99, %c0_100, %c0_101] : memref<8x2x256xf32, #tpu.memory_space<vmem>>, vector<1x2x256xf32>
    %356 = vector.shape_cast %355 : vector<1x2x256xf32> to vector<2x256xf32>
    %357 = vector.extract_strided_slice %354 {offsets = [0, 0], sizes = [2, 128], strides = [1, 1]} : vector<2x256xf32> to vector<2x128xf32>
    %358 = vector.extract_strided_slice %352 {offsets = [0, 0], sizes = [2, 128], strides = [1, 1]} : vector<2x256xf32> to vector<2x128xf32>
    %359 = arith.addf %357, %358 : vector<2x128xf32>
    %360 = vector.extract_strided_slice %359 {offsets = [0, 0], sizes = [2, 32], strides = [1, 1]} : vector<2x128xf32> to vector<2x32xf32>
    %361 = arith.negf %360 : vector<2x32xf32>
    %362 = math.exp %361 : vector<2x32xf32>
    %cst_102 = arith.constant 1.000000e+00 : f32
    %363 = vector.broadcast %cst_102 : f32 to vector<2x32xf32>
    %364 = arith.addf %363, %362 : vector<2x32xf32>
    %365 = arith.divf %363, %364 : vector<2x32xf32>
    %366 = vector.extract_strided_slice %359 {offsets = [0, 32], sizes = [2, 32], strides = [1, 1]} : vector<2x128xf32> to vector<2x32xf32>
    %367 = arith.negf %366 : vector<2x32xf32>
    %368 = math.exp %367 : vector<2x32xf32>
    %cst_103 = arith.constant 1.000000e+00 : f32
    %369 = vector.broadcast %cst_103 : f32 to vector<2x32xf32>
    %370 = arith.addf %369, %368 : vector<2x32xf32>
    %371 = arith.divf %369, %370 : vector<2x32xf32>
    %372 = vector.extract_strided_slice %359 {offsets = [0, 64], sizes = [2, 32], strides = [1, 1]} : vector<2x128xf32> to vector<2x32xf32>
    %373 = math.tanh %372 : vector<2x32xf32>
    %374 = vector.extract_strided_slice %359 {offsets = [0, 96], sizes = [2, 32], strides = [1, 1]} : vector<2x128xf32> to vector<2x32xf32>
    %375 = arith.negf %374 : vector<2x32xf32>
    %376 = math.exp %375 : vector<2x32xf32>
    %cst_104 = arith.constant 1.000000e+00 : f32
    %377 = vector.broadcast %cst_104 : f32 to vector<2x32xf32>
    %378 = arith.addf %377, %376 : vector<2x32xf32>
    %379 = arith.divf %377, %378 : vector<2x32xf32>
    %380 = arith.mulf %371, %313 : vector<2x32xf32>
    %381 = arith.mulf %365, %373 : vector<2x32xf32>
    %382 = arith.addf %380, %381 : vector<2x32xf32>
    %383 = math.tanh %382 : vector<2x32xf32>
    %384 = arith.mulf %379, %383 : vector<2x32xf32>
    %385 = vector.extract_strided_slice %356 {offsets = [0, 128], sizes = [2, 128], strides = [1, 1]} : vector<2x256xf32> to vector<2x128xf32>
    %386 = vector.extract_strided_slice %352 {offsets = [0, 128], sizes = [2, 128], strides = [1, 1]} : vector<2x256xf32> to vector<2x128xf32>
    %387 = arith.addf %385, %386 : vector<2x128xf32>
    %388 = vector.extract_strided_slice %387 {offsets = [0, 0], sizes = [2, 32], strides = [1, 1]} : vector<2x128xf32> to vector<2x32xf32>
    %389 = arith.negf %388 : vector<2x32xf32>
    %390 = math.exp %389 : vector<2x32xf32>
    %cst_105 = arith.constant 1.000000e+00 : f32
    %391 = vector.broadcast %cst_105 : f32 to vector<2x32xf32>
    %392 = arith.addf %391, %390 : vector<2x32xf32>
    %393 = arith.divf %391, %392 : vector<2x32xf32>
    %394 = vector.extract_strided_slice %387 {offsets = [0, 32], sizes = [2, 32], strides = [1, 1]} : vector<2x128xf32> to vector<2x32xf32>
    %395 = arith.negf %394 : vector<2x32xf32>
    %396 = math.exp %395 : vector<2x32xf32>
    %cst_106 = arith.constant 1.000000e+00 : f32
    %397 = vector.broadcast %cst_106 : f32 to vector<2x32xf32>
    %398 = arith.addf %397, %396 : vector<2x32xf32>
    %399 = arith.divf %397, %398 : vector<2x32xf32>
    %400 = vector.extract_strided_slice %387 {offsets = [0, 64], sizes = [2, 32], strides = [1, 1]} : vector<2x128xf32> to vector<2x32xf32>
    %401 = math.tanh %400 : vector<2x32xf32>
    %402 = vector.extract_strided_slice %387 {offsets = [0, 96], sizes = [2, 32], strides = [1, 1]} : vector<2x128xf32> to vector<2x32xf32>
    %403 = arith.negf %402 : vector<2x32xf32>
    %404 = math.exp %403 : vector<2x32xf32>
    %cst_107 = arith.constant 1.000000e+00 : f32
    %405 = vector.broadcast %cst_107 : f32 to vector<2x32xf32>
    %406 = arith.addf %405, %404 : vector<2x32xf32>
    %407 = arith.divf %405, %406 : vector<2x32xf32>
    %408 = arith.mulf %399, %341 : vector<2x32xf32>
    %409 = arith.mulf %393, %401 : vector<2x32xf32>
    %410 = arith.addf %408, %409 : vector<2x32xf32>
    %411 = math.tanh %410 : vector<2x32xf32>
    %412 = arith.mulf %407, %411 : vector<2x32xf32>
    %c5_108 = arith.constant 5 : index
    %c0_109 = arith.constant 0 : index
    %c0_110 = arith.constant 0 : index
    %413 = vector.load %arg4[%c5_108, %c0_109, %c0_110] : memref<8x2x64xf32, #tpu.memory_space<vmem>>, vector<1x2x32xf32>
    %414 = vector.shape_cast %413 : vector<1x2x32xf32> to vector<2x32xf32>
    %415 = vector.shape_cast %384 : vector<2x32xf32> to vector<1x2x32xf32>
    tpu.vector_store %arg4[%c5_108, %c0_109, %c0_110], %415 {strides = array<i32>} : memref<8x2x64xf32, #tpu.memory_space<vmem>>, vector<1x2x32xf32>,
    %c2_111 = arith.constant 2 : index
    %c0_112 = arith.constant 0 : index
    %c32_113 = arith.constant 32 : index
    %416 = vector.load %arg4[%c2_111, %c0_112, %c32_113] : memref<8x2x64xf32, #tpu.memory_space<vmem>>, vector<1x2x32xf32>
    %417 = vector.shape_cast %416 : vector<1x2x32xf32> to vector<2x32xf32>
    %418 = vector.shape_cast %412 : vector<2x32xf32> to vector<1x2x32xf32>
    tpu.vector_store %arg4[%c2_111, %c0_112, %c32_113], %418 {strides = array<i32>} : memref<8x2x64xf32, #tpu.memory_space<vmem>>, vector<1x2x32xf32>,
    %419 = tpu.concatenate %384, %412 in 1 : vector<2x32xf32>, vector<2x32xf32> -> vector<2x64xf32>
    %420 = arith.truncf %419 : vector<2x64xf32> to vector<2x64xbf16>
    %cst_114 = arith.constant dense<0.000000e+00> : vector<2x256xf32>
    %421 = tpu.matmul %420, %0, %cst_114 {dimension_numbers = #tpu.dot_dimension_numbers<[1], [0], [0], [1], [0, 0, 1, 1], [], []>} : vector<2x64xbf16>, vector<64x256xbf16>, vector<2x256xf32> -> vector<2x256xf32>
    %c6_115 = arith.constant 6 : index
    %c0_116 = arith.constant 0 : index
    %c0_117 = arith.constant 0 : index
    %422 = vector.load %arg0[%c6_115, %c0_116, %c0_117] : memref<8x2x256xf32, #tpu.memory_space<vmem>>, vector<1x2x256xf32>
    %423 = vector.shape_cast %422 : vector<1x2x256xf32> to vector<2x256xf32>
    %c1_118 = arith.constant 1 : index
    %c0_119 = arith.constant 0 : index
    %c0_120 = arith.constant 0 : index
    %424 = vector.load %arg0[%c1_118, %c0_119, %c0_120] : memref<8x2x256xf32, #tpu.memory_space<vmem>>, vector<1x2x256xf32>
    %425 = vector.shape_cast %424 : vector<1x2x256xf32> to vector<2x256xf32>
    %426 = vector.extract_strided_slice %423 {offsets = [0, 0], sizes = [2, 128], strides = [1, 1]} : vector<2x256xf32> to vector<2x128xf32>
    %427 = vector.extract_strided_slice %421 {offsets = [0, 0], sizes = [2, 128], strides = [1, 1]} : vector<2x256xf32> to vector<2x128xf32>
    %428 = arith.addf %426, %427 : vector<2x128xf32>
    %429 = vector.extract_strided_slice %428 {offsets = [0, 0], sizes = [2, 32], strides = [1, 1]} : vector<2x128xf32> to vector<2x32xf32>
    %430 = arith.negf %429 : vector<2x32xf32>
    %431 = math.exp %430 : vector<2x32xf32>
    %cst_121 = arith.constant 1.000000e+00 : f32
    %432 = vector.broadcast %cst_121 : f32 to vector<2x32xf32>
    %433 = arith.addf %432, %431 : vector<2x32xf32>
    %434 = arith.divf %432, %433 : vector<2x32xf32>
    %435 = vector.extract_strided_slice %428 {offsets = [0, 32], sizes = [2, 32], strides = [1, 1]} : vector<2x128xf32> to vector<2x32xf32>
    %436 = arith.negf %435 : vector<2x32xf32>
    %437 = math.exp %436 : vector<2x32xf32>
    %cst_122 = arith.constant 1.000000e+00 : f32
    %438 = vector.broadcast %cst_122 : f32 to vector<2x32xf32>
    %439 = arith.addf %438, %437 : vector<2x32xf32>
    %440 = arith.divf %438, %439 : vector<2x32xf32>
    %441 = vector.extract_strided_slice %428 {offsets = [0, 64], sizes = [2, 32], strides = [1, 1]} : vector<2x128xf32> to vector<2x32xf32>
    %442 = math.tanh %441 : vector<2x32xf32>
    %443 = vector.extract_strided_slice %428 {offsets = [0, 96], sizes = [2, 32], strides = [1, 1]} : vector<2x128xf32> to vector<2x32xf32>
    %444 = arith.negf %443 : vector<2x32xf32>
    %445 = math.exp %444 : vector<2x32xf32>
    %cst_123 = arith.constant 1.000000e+00 : f32
    %446 = vector.broadcast %cst_123 : f32 to vector<2x32xf32>
    %447 = arith.addf %446, %445 : vector<2x32xf32>
    %448 = arith.divf %446, %447 : vector<2x32xf32>
    %449 = arith.mulf %440, %382 : vector<2x32xf32>
    %450 = arith.mulf %434, %442 : vector<2x32xf32>
    %451 = arith.addf %449, %450 : vector<2x32xf32>
    %452 = math.tanh %451 : vector<2x32xf32>
    %453 = arith.mulf %448, %452 : vector<2x32xf32>
    %454 = vector.extract_strided_slice %425 {offsets = [0, 128], sizes = [2, 128], strides = [1, 1]} : vector<2x256xf32> to vector<2x128xf32>
    %455 = vector.extract_strided_slice %421 {offsets = [0, 128], sizes = [2, 128], strides = [1, 1]} : vector<2x256xf32> to vector<2x128xf32>
    %456 = arith.addf %454, %455 : vector<2x128xf32>
    %457 = vector.extract_strided_slice %456 {offsets = [0, 0], sizes = [2, 32], strides = [1, 1]} : vector<2x128xf32> to vector<2x32xf32>
    %458 = arith.negf %457 : vector<2x32xf32>
    %459 = math.exp %458 : vector<2x32xf32>
    %cst_124 = arith.constant 1.000000e+00 : f32
    %460 = vector.broadcast %cst_124 : f32 to vector<2x32xf32>
    %461 = arith.addf %460, %459 : vector<2x32xf32>
    %462 = arith.divf %460, %461 : vector<2x32xf32>
    %463 = vector.extract_strided_slice %456 {offsets = [0, 32], sizes = [2, 32], strides = [1, 1]} : vector<2x128xf32> to vector<2x32xf32>
    %464 = arith.negf %463 : vector<2x32xf32>
    %465 = math.exp %464 : vector<2x32xf32>
    %cst_125 = arith.constant 1.000000e+00 : f32
    %466 = vector.broadcast %cst_125 : f32 to vector<2x32xf32>
    %467 = arith.addf %466, %465 : vector<2x32xf32>
    %468 = arith.divf %466, %467 : vector<2x32xf32>
    %469 = vector.extract_strided_slice %456 {offsets = [0, 64], sizes = [2, 32], strides = [1, 1]} : vector<2x128xf32> to vector<2x32xf32>
    %470 = math.tanh %469 : vector<2x32xf32>
    %471 = vector.extract_strided_slice %456 {offsets = [0, 96], sizes = [2, 32], strides = [1, 1]} : vector<2x128xf32> to vector<2x32xf32>
    %472 = arith.negf %471 : vector<2x32xf32>
    %473 = math.exp %472 : vector<2x32xf32>
    %cst_126 = arith.constant 1.000000e+00 : f32
    %474 = vector.broadcast %cst_126 : f32 to vector<2x32xf32>
    %475 = arith.addf %474, %473 : vector<2x32xf32>
    %476 = arith.divf %474, %475 : vector<2x32xf32>
    %477 = arith.mulf %468, %410 : vector<2x32xf32>
    %478 = arith.mulf %462, %470 : vector<2x32xf32>
    %479 = arith.addf %477, %478 : vector<2x32xf32>
    %480 = math.tanh %479 : vector<2x32xf32>
    %481 = arith.mulf %476, %480 : vector<2x32xf32>
    %c6_127 = arith.constant 6 : index
    %c0_128 = arith.constant 0 : index
    %c0_129 = arith.constant 0 : index
    %482 = vector.load %arg4[%c6_127, %c0_128, %c0_129] : memref<8x2x64xf32, #tpu.memory_space<vmem>>, vector<1x2x32xf32>
    %483 = vector.shape_cast %482 : vector<1x2x32xf32> to vector<2x32xf32>
    %484 = vector.shape_cast %453 : vector<2x32xf32> to vector<1x2x32xf32>
    tpu.vector_store %arg4[%c6_127, %c0_128, %c0_129], %484 {strides = array<i32>} : memref<8x2x64xf32, #tpu.memory_space<vmem>>, vector<1x2x32xf32>,
    %c1_130 = arith.constant 1 : index
    %c0_131 = arith.constant 0 : index
    %c32_132 = arith.constant 32 : index
    %485 = vector.load %arg4[%c1_130, %c0_131, %c32_132] : memref<8x2x64xf32, #tpu.memory_space<vmem>>, vector<1x2x32xf32>
    %486 = vector.shape_cast %485 : vector<1x2x32xf32> to vector<2x32xf32>
    %487 = vector.shape_cast %481 : vector<2x32xf32> to vector<1x2x32xf32>
    tpu.vector_store %arg4[%c1_130, %c0_131, %c32_132], %487 {strides = array<i32>} : memref<8x2x64xf32, #tpu.memory_space<vmem>>, vector<1x2x32xf32>,
    %488 = tpu.concatenate %453, %481 in 1 : vector<2x32xf32>, vector<2x32xf32> -> vector<2x64xf32>
    %489 = arith.truncf %488 : vector<2x64xf32> to vector<2x64xbf16>
    %cst_133 = arith.constant dense<0.000000e+00> : vector<2x256xf32>
    %490 = tpu.matmul %489, %0, %cst_133 {dimension_numbers = #tpu.dot_dimension_numbers<[1], [0], [0], [1], [0, 0, 1, 1], [], []>} : vector<2x64xbf16>, vector<64x256xbf16>, vector<2x256xf32> -> vector<2x256xf32>
    %c7_134 = arith.constant 7 : index
    %c0_135 = arith.constant 0 : index
    %c0_136 = arith.constant 0 : index
    %491 = vector.load %arg0[%c7_134, %c0_135, %c0_136] : memref<8x2x256xf32, #tpu.memory_space<vmem>>, vector<1x2x256xf32>
    %492 = vector.shape_cast %491 : vector<1x2x256xf32> to vector<2x256xf32>
    %c0_137 = arith.constant 0 : index
    %c0_138 = arith.constant 0 : index
    %c0_139 = arith.constant 0 : index
    %493 = vector.load %arg0[%c0_137, %c0_138, %c0_139] : memref<8x2x256xf32, #tpu.memory_space<vmem>>, vector<1x2x256xf32>
    %494 = vector.shape_cast %493 : vector<1x2x256xf32> to vector<2x256xf32>
    %495 = vector.extract_strided_slice %492 {offsets = [0, 0], sizes = [2, 128], strides = [1, 1]} : vector<2x256xf32> to vector<2x128xf32>
    %496 = vector.extract_strided_slice %490 {offsets = [0, 0], sizes = [2, 128], strides = [1, 1]} : vector<2x256xf32> to vector<2x128xf32>
    %497 = arith.addf %495, %496 : vector<2x128xf32>
    %498 = vector.extract_strided_slice %497 {offsets = [0, 0], sizes = [2, 32], strides = [1, 1]} : vector<2x128xf32> to vector<2x32xf32>
    %499 = arith.negf %498 : vector<2x32xf32>
    %500 = math.exp %499 : vector<2x32xf32>
    %cst_140 = arith.constant 1.000000e+00 : f32
    %501 = vector.broadcast %cst_140 : f32 to vector<2x32xf32>
    %502 = arith.addf %501, %500 : vector<2x32xf32>
    %503 = arith.divf %501, %502 : vector<2x32xf32>
    %504 = vector.extract_strided_slice %497 {offsets = [0, 32], sizes = [2, 32], strides = [1, 1]} : vector<2x128xf32> to vector<2x32xf32>
    %505 = arith.negf %504 : vector<2x32xf32>
    %506 = math.exp %505 : vector<2x32xf32>
    %cst_141 = arith.constant 1.000000e+00 : f32
    %507 = vector.broadcast %cst_141 : f32 to vector<2x32xf32>
    %508 = arith.addf %507, %506 : vector<2x32xf32>
    %509 = arith.divf %507, %508 : vector<2x32xf32>
    %510 = vector.extract_strided_slice %497 {offsets = [0, 64], sizes = [2, 32], strides = [1, 1]} : vector<2x128xf32> to vector<2x32xf32>
    %511 = math.tanh %510 : vector<2x32xf32>
    %512 = vector.extract_strided_slice %497 {offsets = [0, 96], sizes = [2, 32], strides = [1, 1]} : vector<2x128xf32> to vector<2x32xf32>
    %513 = arith.negf %512 : vector<2x32xf32>
    %514 = math.exp %513 : vector<2x32xf32>
    %cst_142 = arith.constant 1.000000e+00 : f32
    %515 = vector.broadcast %cst_142 : f32 to vector<2x32xf32>
    %516 = arith.addf %515, %514 : vector<2x32xf32>
    %517 = arith.divf %515, %516 : vector<2x32xf32>
    %518 = arith.mulf %509, %451 : vector<2x32xf32>
    %519 = arith.mulf %503, %511 : vector<2x32xf32>
    %520 = arith.addf %518, %519 : vector<2x32xf32>
    %521 = math.tanh %520 : vector<2x32xf32>
    %522 = arith.mulf %517, %521 : vector<2x32xf32>
    %523 = vector.extract_strided_slice %494 {offsets = [0, 128], sizes = [2, 128], strides = [1, 1]} : vector<2x256xf32> to vector<2x128xf32>
    %524 = vector.extract_strided_slice %490 {offsets = [0, 128], sizes = [2, 128], strides = [1, 1]} : vector<2x256xf32> to vector<2x128xf32>
    %525 = arith.addf %523, %524 : vector<2x128xf32>
    %526 = vector.extract_strided_slice %525 {offsets = [0, 0], sizes = [2, 32], strides = [1, 1]} : vector<2x128xf32> to vector<2x32xf32>
    %527 = arith.negf %526 : vector<2x32xf32>
    %528 = math.exp %527 : vector<2x32xf32>
    %cst_143 = arith.constant 1.000000e+00 : f32
    %529 = vector.broadcast %cst_143 : f32 to vector<2x32xf32>
    %530 = arith.addf %529, %528 : vector<2x32xf32>
    %531 = arith.divf %529, %530 : vector<2x32xf32>
    %532 = vector.extract_strided_slice %525 {offsets = [0, 32], sizes = [2, 32], strides = [1, 1]} : vector<2x128xf32> to vector<2x32xf32>
    %533 = arith.negf %532 : vector<2x32xf32>
    %534 = math.exp %533 : vector<2x32xf32>
    %cst_144 = arith.constant 1.000000e+00 : f32
    %535 = vector.broadcast %cst_144 : f32 to vector<2x32xf32>
    %536 = arith.addf %535, %534 : vector<2x32xf32>
    %537 = arith.divf %535, %536 : vector<2x32xf32>
    %538 = vector.extract_strided_slice %525 {offsets = [0, 64], sizes = [2, 32], strides = [1, 1]} : vector<2x128xf32> to vector<2x32xf32>
    %539 = math.tanh %538 : vector<2x32xf32>
    %540 = vector.extract_strided_slice %525 {offsets = [0, 96], sizes = [2, 32], strides = [1, 1]} : vector<2x128xf32> to vector<2x32xf32>
    %541 = arith.negf %540 : vector<2x32xf32>
    %542 = math.exp %541 : vector<2x32xf32>
    %cst_145 = arith.constant 1.000000e+00 : f32
    %543 = vector.broadcast %cst_145 : f32 to vector<2x32xf32>
    %544 = arith.addf %543, %542 : vector<2x32xf32>
    %545 = arith.divf %543, %544 : vector<2x32xf32>
    %546 = arith.mulf %537, %479 : vector<2x32xf32>
    %547 = arith.mulf %531, %539 : vector<2x32xf32>
    %548 = arith.addf %546, %547 : vector<2x32xf32>
    %549 = math.tanh %548 : vector<2x32xf32>
    %550 = arith.mulf %545, %549 : vector<2x32xf32>
    %c7_146 = arith.constant 7 : index
    %c0_147 = arith.constant 0 : index
    %c0_148 = arith.constant 0 : index
    %551 = vector.load %arg4[%c7_146, %c0_147, %c0_148] : memref<8x2x64xf32, #tpu.memory_space<vmem>>, vector<1x2x32xf32>
    %552 = vector.shape_cast %551 : vector<1x2x32xf32> to vector<2x32xf32>
    %553 = vector.shape_cast %522 : vector<2x32xf32> to vector<1x2x32xf32>
    tpu.vector_store %arg4[%c7_146, %c0_147, %c0_148], %553 {strides = array<i32>} : memref<8x2x64xf32, #tpu.memory_space<vmem>>, vector<1x2x32xf32>,
    %c0_149 = arith.constant 0 : index
    %c0_150 = arith.constant 0 : index
    %c32_151 = arith.constant 32 : index
    %554 = vector.load %arg4[%c0_149, %c0_150, %c32_151] : memref<8x2x64xf32, #tpu.memory_space<vmem>>, vector<1x2x32xf32>
    %555 = vector.shape_cast %554 : vector<1x2x32xf32> to vector<2x32xf32>
    %556 = vector.shape_cast %550 : vector<2x32xf32> to vector<1x2x32xf32>
    tpu.vector_store %arg4[%c0_149, %c0_150, %c32_151], %556 {strides = array<i32>} : memref<8x2x64xf32, #tpu.memory_space<vmem>>, vector<1x2x32xf32>,
    %c0_152 = arith.constant 0 : index
    %c0_153 = arith.constant 0 : index
    %c0_154 = arith.constant 0 : index
    %557 = vector.load %arg5[%c0_152, %c0_153, %c0_154] : memref<2x2x32xf32, #tpu.memory_space<vmem>>, vector<1x2x32xf32>
    %558 = vector.shape_cast %557 : vector<1x2x32xf32> to vector<2x32xf32>
    %559 = vector.shape_cast %522 : vector<2x32xf32> to vector<1x2x32xf32>
    tpu.vector_store %arg5[%c0_152, %c0_153, %c0_154], %559 {strides = array<i32>} : memref<2x2x32xf32, #tpu.memory_space<vmem>>, vector<1x2x32xf32>,
    %c1_155 = arith.constant 1 : index
    %c0_156 = arith.constant 0 : index
    %c0_157 = arith.constant 0 : index
    %560 = vector.load %arg5[%c1_155, %c0_156, %c0_157] : memref<2x2x32xf32, #tpu.memory_space<vmem>>, vector<1x2x32xf32>
    %561 = vector.shape_cast %560 : vector<1x2x32xf32> to vector<2x32xf32>
    %562 = vector.shape_cast %550 : vector<2x32xf32> to vector<1x2x32xf32>
    tpu.vector_store %arg5[%c1_155, %c0_156, %c0_157], %562 {strides = array<i32>} : memref<2x2x32xf32, #tpu.memory_space<vmem>>, vector<1x2x32xf32>,
    %c0_158 = arith.constant 0 : index
    %c0_159 = arith.constant 0 : index
    %c0_160 = arith.constant 0 : index
    %563 = vector.load %arg6[%c0_158, %c0_159, %c0_160] : memref<2x2x32xf32, #tpu.memory_space<vmem>>, vector<1x2x32xf32>
    %564 = vector.shape_cast %563 : vector<1x2x32xf32> to vector<2x32xf32>
    %565 = vector.shape_cast %520 : vector<2x32xf32> to vector<1x2x32xf32>
    tpu.vector_store %arg6[%c0_158, %c0_159, %c0_160], %565 {strides = array<i32>} : memref<2x2x32xf32, #tpu.memory_space<vmem>>, vector<1x2x32xf32>,
    %c1_161 = arith.constant 1 : index
    %c0_162 = arith.constant 0 : index
    %c0_163 = arith.constant 0 : index
    %566 = vector.load %arg6[%c1_161, %c0_162, %c0_163] : memref<2x2x32xf32, #tpu.memory_space<vmem>>, vector<1x2x32xf32>
    %567 = vector.shape_cast %566 : vector<1x2x32xf32> to vector<2x32xf32>
    %568 = vector.shape_cast %548 : vector<2x32xf32> to vector<1x2x32xf32>
    tpu.vector_store %arg6[%c1_161, %c0_162, %c0_163], %568 {strides = array<i32>} : memref<2x2x32xf32, #tpu.memory_space<vmem>>, vector<1x2x32xf32>,
    return
  }
}

</mosaic_0001>

<bundles_post_ra>
// kernel: bilstm_forward.1
= control target key start
LH: loop header
LB: loop body
LE: loop exit
PB: predicated region body
PF: predicated region fallthrough
CT: control target
= control target key end

     0   :  { %12 = vsyncpa [#allocation3], 0  ;;  %v135_v1 = vlaneseq  ;;  %v1444_v3 = vmov 0   ;;  %v1445_v5 = vmov 1983009808   ;;  %s1872_s0 = inlined_call_operand.vmem [shape: f32[8,2,256], index: 0, kind: input, shape index: {}]   ;;  %s1873_s1 = inlined_call_operand.vmem [shape: bf16[64,256], index: 1, kind: input, shape index: {}]   ;;  %s1874_s2 = inlined_call_operand.vmem [shape: f32[2,64], index: 2, kind: input, shape index: {}]   ;;  %s1875_s3 = inlined_call_operand.vmem [shape: f32[2,64], index: 3, kind: input, shape index: {}]   ;;  %s1876_s4 = inlined_call_operand.hbm [shape: f32[8,2,64], index: 4, kind: output, shape index: {0}]   ;;  %s1877_s5 = inlined_call_operand.hbm [shape: f32[2,2,32], index: 5, kind: output, shape index: {1}]   ;;  %s1878_s6 = inlined_call_operand.hbm [shape: f32[2,2,32], index: 6, kind: output, shape index: {2}]  }
   0x1   :  { %v1491_v0 = vld [vmem:[%s1873_s1 + $0x4] ss:$8 sps:$4 sm:$0xff]   ;;  %v1496_v2 = vld [vmem:[%s1873_s1] ss:$8 sps:$4 sm:$0xff]   ;;  %111 = vmatprep.mubr.bf16.mxu0 %v1444_v3  ;;  %251 = vmatprep.mubr.bf16.mxu1 %v1444_v3  ;;  %v1504_v4 = vld [vmem:[%s1873_s1 + $0x14] ss:$8 sps:$4 sm:$0xff]   ;;  %v133_v6 = vunpack.c.l.s4 %v1445_v5 }
   0x2   :  { %79 = vmatprep.subr.bf16.mxu0 %v1491_v0  ;;  %v136_v7 = vshrl.u32 %v135_v1, 7  ;;  %219 = vmatprep.subr.bf16.mxu1 %v1491_v0  ;;  %v1511_v8 = vld [vmem:[%s1873_s1 + $0x10] ss:$8 sps:$4 sm:$0xff]   ;;  %v1518_v9 = vld [vmem:[%s1873_s1 + $0x24] ss:$8 sps:$4 sm:$0xff]  }
   0x3   :  { %80 = vmatpush1.bf16.msra.mxu0 %v1496_v2  ;;  %220 = vmatpush1.bf16.msra.mxu1 %v1496_v2  ;;  %v134_v10 = vunpack.c.0.s8 %v133_v6  ;;  %v1524_v11 = vld [vmem:[%s1875_s3] sm:$0x3] }
   0x4   :  { %81 = vmatprep.subr.bf16.mxu0 %v1504_v4  ;;  %221 = vmatprep.subr.bf16.mxu1 %v1504_v4 }
   0x5   :  { %v1526_v12 = vsub.s32 %v134_v10, %v136_v7 }
   0x6   :  { %13 = vsyncpa [#allocation5], 0  ;;  %v1532_v13 = vld [vmem:[%s1873_s1 + $0x20] ss:$8 sps:$4 sm:$0xff]   ;;  %v1539_v14 = vld [vmem:[%s1873_s1 + $0x34] ss:$8 sps:$4 sm:$0xff]  }
   0x7   :  { %82 = vmatpush1.bf16.msra.mxu0 %v1511_v8  ;;  %222 = vmatpush1.bf16.msra.mxu1 %v1511_v8  ;;  %v138_v15 = vrot.slane %v1524_v11, %v1526_v12  ;;  %s1446_s3 = smov 32   ;;  %v1549_v16 = vld [vmem:[%s1873_s1 + $0x30] ss:$8 sps:$4 sm:$0xff]   ;;  %v31_v17 = vld [vmem:[%s1874_s2] sm:$0x3]  ;;  %vm75_vm0 = vcmask 523264  }
   0x8   :  { %83 = vmatprep.subr.bf16.mxu0 %v1518_v9  ;;  %223 = vmatprep.subr.bf16.mxu1 %v1518_v9  ;;  %v34_v18 = vpack.c.bf16 %v31_v17, %v31_v17  ;;  %v1188_v19 = vld [vmem:[%s1872_s0 + $0x1c] sm:$0xf]  ;;  %v120_v20 = vld [vmem:[%s1872_s0] sm:$0xf]  ;;  %s1447_s19 = smov 64   ;;  %vm198_vm1 = vcmask 254976  }
   0x9   :  { %139 = vrot.lane.b32.xlu1 %v138_v15, %s1446_s3  ;;  %v160_v21 = vrot.slane %v1188_v19, 2  ;;  %vm33_vm2 = vcmask 261120   ;;  %vm212_vm3 = vcmask 517376   ;;  %v1193_v61 = vld [vmem:[%s1872_s0 + $0x18] sm:$0xf]  ;;  %s1449_s23 = smov [#allocation4]  }
   0xa   :  { %v1192_v62 = vld [vmem:[%s1872_s0 + $0x4] sm:$0xf]  ;;  %v290_v63 = vrot.slane %v1193_v61, 2  ;;  %s1149_s24 = sshll.u32 %s1449_s23, 4  ;;  %s1450_s25 = smov [#allocation2]   ;;  %s1150_s24 = int_to_ptr.vmem [resolvable:$true] %s1149_s24 }
   0xb   :  { %84 = vmatpush1.bf16.msra.mxu0 %v1532_v13  ;;  %224 = vmatpush1.bf16.msra.mxu1 %v1532_v13  ;;  %s1137_s26 = sshll.u32 %s1450_s25, 4  ;;  %p1379_p1 = scmp.lt.s32.totalorder %s1150_s24, %s1150_s24  ;;  %s1817_s26 = int_to_ptr.vmem [resolvable:$true] %s1137_s26 }
   0xc   :  { %85 = vmatprep.subr.bf16.mxu0 %v1539_v14  ;;  %225 = vmatprep.subr.bf16.mxu1 %v1539_v14 }
   0xf   :  { %86 = vmatpush1.bf16.msra.mxu0 %v1549_v16  ;;  %226 = vmatpush1.bf16.msra.mxu1 %v1549_v16 }
  0x10   :  { %348 = vmatprep.subr.bf16.mxu0 %v1491_v0  ;;  %477 = vmatprep.subr.bf16.mxu1 %v1491_v0 }
  0x12   :  { %1187 = vmatmul.mubr.msk.bf16.vlgmr.msra.gmra.mrb[0].mxu0 %vm75_vm0, %v34_v18 }
  0x13   :  { %349 = vmatpush1.bf16.msra.mxu0 %v1496_v2  ;;  %380 = vmatprep.mubr.bf16.mxu0 %v1444_v3 }
  0x14   :  { %350 = vmatprep.subr.bf16.mxu0 %v1504_v4 }
  0x17   :  { %351 = vmatpush1.bf16.msra.mxu0 %v1511_v8 }
  0x18   :  { %352 = vmatprep.subr.bf16.mxu0 %v1518_v9 }
  0x1b   :  { %353 = vmatpush1.bf16.msra.mxu0 %v1532_v13 }
  0x1c   :  { %354 = vmatprep.subr.bf16.mxu0 %v1539_v14 }
  0x1f   :  { %355 = vmatpush1.bf16.msra.mxu0 %v1549_v16 }
  0x20   :  { %606 = vmatprep.subr.bf16.mxu0 %v1491_v0 }
  0x7b   :  { %v140_v42 = vpop.permute.xlu1 %139 }
  0xe5   :  { %v113_v22 = vpop.f32.mrb[0].mxu0 }
  0xe6   :  { %v123_v23 = vadd.f32 %v120_v20, %v113_v22  ;;  %v115_v24 = vpop.f32.mrb[1].mxu0 }
  0xe7   :  { %v117_v25 = vpop.f32.mrb[2].mxu0  ;;  %v162_v26 = vadd.f32 %v160_v21, %v115_v24 }
  0xe8   :  { %1246 = vtanh.f32 %v123_v23  ;;  %v118_v27 = vpop.f32.mrb[3].mxu0  ;;  %v1189_v30 = vmul.f32 -1.442695, %v123_v23 }
  0xe9   :  { %1248 = vtanh.f32 %v162_v26  ;;  %v1190_v31 = vmul.f32 -1.442695, %v162_v26 }
  0xea   :  { %1250 = vpow2.f32 %v1189_v30 }
  0xeb   :  { %1252 = vpow2.f32 %v1190_v31 }
  0xf2   :  { %v1247_v28 = vpop.eup %1246 }
  0xf3   :  { %144 = vrot.lane.b32.xlu0 %v1247_v28, %s1447_s19  ;;  %v1249_v29 = vpop.eup %1248 }
  0xf4   :  { %v1251_v32 = vpop.eup %1250 }
  0xf5   :  { %v127_v33 = vadd.f32 1.0, %v1251_v32  ;;  %v1253_v34 = vpop.eup %1252 }
  0xf6   :  { %v166_v35 = vadd.f32 1.0, %v1253_v34 }
  0xf7   :  { %172 = vrot.lane.b32.xlu0 %v1249_v29, %s1447_s19  ;;  %1254 = vrcp.f32 %v127_v33 }
  0xf8   :  { %1256 = vrcp.f32 %v166_v35 }
 0x101   :  { %v1255_v36 = vpop.eup %1254 }
 0x102   :  { %v1257_v39 = vpop.eup %1256  ;;  %v142_v43 = vmul.f32 %v1255_v36, %v140_v42 }
 0x103   :  { %v170_v46 = vmul.f32 %v1257_v39, %v1524_v11 }
 0x165   :  { %v145_v37 = vpop.permute.xlu0 %144 }
 0x166   :  { %v147_v38 = vmul.f32 %v1255_v36, %v145_v37 }
 0x168   :  { %149 = vrot.lane.b32.xlu1 %v147_v38, %s1446_s3 }
 0x169   :  { %v173_v40 = vpop.permute.xlu0 %172 }
 0x16a   :  { %v175_v41 = vmul.f32 %v1257_v39, %v173_v40 }
 0x16c   :  { %177 = vrot.lane.b32.xlu0 %v175_v41, %s1446_s3 }
 0x1da   :  { %v150_v44 = vpop.permute.xlu1 %149 }
 0x1db   :  { %v1581_v45 = vadd.f32 %v150_v44, %v142_v43 }
 0x1dd   :  { %1258 = vtanh.f32 %v1581_v45 }
 0x1de   :  { %v178_v47 = vpop.permute.xlu0 %177 }
 0x1df   :  { %v1585_v48 = vadd.f32 %v178_v47, %v170_v46 }
 0x1e1   :  { %1260 = vtanh.f32 %v1585_v48 }
 0x1e7   :  { %v1259_v49 = vpop.eup %1258 }
 0x1e8   :  { %155 = vrot.lane.b32.xlu1 %v1259_v49, %s1447_s19  ;;  %v1197_v49 = vld [vmem:[%s1872_s0 + $0x8] sm:$0xf] }
 0x1eb   :  { %v1261_v50 = vpop.eup %1260 }
 0x1ec   :  { %183 = vrot.lane.b32.xlu0 %v1261_v50, %s1447_s19 }
 0x25a   :  { %v156_v51 = vpop.permute.xlu1 %155 }
 0x25b   :  { %v158_v52 = vmul.f32 %v1255_v36, %v156_v51 }
 0x25d   :  { %v194_v53 = vrot.slane %v158_v52, %v1526_v12 }
 0x25e   :  { %v184_v54 = vpop.permute.xlu0 %183 }
 0x25f   :  { %v186_v55 = vmul.f32 %v1257_v39, %v184_v54  ;;  %195 = vrot.lane.b32.xlu1 %v194_v53, %s1446_s3 }
 0x261   :  { %v207_v56 = vrot.slane %v186_v55, %v1526_v12 }
 0x263   :  { %208 = vrot.lane.b32.xlu0 %v207_v56, %s1447_s19 }
 0x2d1   :  { %v196_v57 = vpop.permute.xlu1 %195 }
 0x2d2   :  { %199 = vst.msk [vmem:[#allocation2] sm:$0x3] %vm198_vm1, %v196_v57 }
 0x2d5   :  { %v209_v58 = vpop.permute.xlu0 %208 }
 0x2d6   :  { %213 = vst.msk [vmem:[#allocation2 + $0xe] sm:$0x3] %vm212_vm3, %v209_v58  ;;  %v214_v59 = vsel %vm33_vm2, %v196_v57, %v209_v58 }
 0x2d7   :  { %v215_v60 = vpack.c.bf16 %v214_v59, %v214_v59 }
 0x2d9   :  { %1191 = vmatmul.mubr.msk.bf16.vlgmr.msra.gmra.mrb[0].mxu1 %vm75_vm0, %v215_v60 }
 0x2da   :  { %478 = vmatpush1.bf16.msra.mxu1 %v1496_v2  ;;  %509 = vmatprep.mubr.bf16.mxu1 %v1444_v3 }
 0x2db   :  { %479 = vmatprep.subr.bf16.mxu1 %v1504_v4 }
 0x2de   :  { %480 = vmatpush1.bf16.msra.mxu1 %v1511_v8 }
 0x2df   :  { %481 = vmatprep.subr.bf16.mxu1 %v1518_v9 }
 0x2e2   :  { %482 = vmatpush1.bf16.msra.mxu1 %v1532_v13 }
 0x2e3   :  { %483 = vmatprep.subr.bf16.mxu1 %v1539_v14 }
 0x2e6   :  { %484 = vmatpush1.bf16.msra.mxu1 %v1549_v16 }
 0x2e7   :  { %731 = vmatprep.subr.bf16.mxu1 %v1491_v0 }
 0x3ac   :  { %v253_v1 = vpop.f32.mrb[0].mxu1 }
 0x3ad   :  { %v264_v5 = vadd.f32 %v1192_v62, %v253_v1  ;;  %v255_v6 = vpop.f32.mrb[1].mxu1 }
 0x3ae   :  { %v292_v7 = vadd.f32 %v290_v63, %v255_v6  ;;  %v257_v10 = vpop.f32.mrb[2].mxu1 }
 0x3af   :  { %1262 = vtanh.f32 %v264_v5  ;;  %v258_v11 = vpop.f32.mrb[3].mxu1  ;;  %v1194_v18 = vmul.f32 -1.442695, %v264_v5 }
 0x3b0   :  { %1264 = vtanh.f32 %v292_v7  ;;  %v1195_v19 = vmul.f32 -1.442695, %v292_v7 }
 0x3b1   :  { %1266 = vpow2.f32 %v1194_v18 }
 0x3b2   :  { %1268 = vpow2.f32 %v1195_v19 }
 0x3b9   :  { %v1263_v15 = vpop.eup %1262 }
 0x3ba   :  { %v1265_v17 = vpop.eup %1264  ;;  %274 = vrot.lane.b32.xlu1 %v1263_v15, %s1447_s19 }
 0x3bb   :  { %302 = vrot.lane.b32.xlu0 %v1265_v17, %s1447_s19  ;;  %v1267_v20 = vpop.eup %1266 }
 0x3bc   :  { %v1269_v21 = vpop.eup %1268  ;;  %v268_v22 = vadd.f32 1.0, %v1267_v20 }
 0x3bd   :  { %v296_v23 = vadd.f32 1.0, %v1269_v21 }
 0x3be   :  { %1270 = vrcp.f32 %v268_v22 }
 0x3bf   :  { %1272 = vrcp.f32 %v296_v23 }
 0x3c8   :  { %v1271_v24 = vpop.eup %1270 }
 0x3c9   :  { %v1273_v26 = vpop.eup %1272  ;;  %v272_v30 = vmul.f32 %v1271_v24, %v1581_v45 }
 0x3ca   :  { %v300_v32 = vmul.f32 %v1273_v26, %v1585_v48  ;;  %v1198_v48 = vld [vmem:[%s1872_s0 + $0x14] sm:$0xf] }
 0x3cb   :  { %v419_v50 = vrot.slane %v1198_v48, 2 }
 0x42c   :  { %v275_v25 = vpop.permute.xlu1 %274 }
 0x42d   :  { %v277_v27 = vmul.f32 %v1271_v24, %v275_v25  ;;  %v303_v28 = vpop.permute.xlu0 %302 }
 0x42e   :  { %v305_v29 = vmul.f32 %v1273_v26, %v303_v28 }
 0x42f   :  { %279 = vrot.lane.b32.xlu1 %v277_v27, %s1446_s3 }
 0x430   :  { %307 = vrot.lane.b32.xlu0 %v305_v29, %s1446_s3 }
 0x4a1   :  { %v280_v31 = vpop.permute.xlu1 %279 }
 0x4a2   :  { %v1619_v33 = vadd.f32 %v280_v31, %v272_v30  ;;  %v308_v34 = vpop.permute.xlu0 %307 }
 0x4a3   :  { %v1621_v35 = vadd.f32 %v308_v34, %v300_v32 }
 0x4a4   :  { %1274 = vtanh.f32 %v1619_v33 }
 0x4a5   :  { %1276 = vtanh.f32 %v1621_v35 }
 0x4ae   :  { %v1275_v36 = vpop.eup %1274 }
 0x4af   :  { %v1277_v37 = vpop.eup %1276  ;;  %285 = vrot.lane.b32.xlu1 %v1275_v36, %s1447_s19  ;;  %v1202_v36 = vld [vmem:[%s1872_s0 + $0xc] sm:$0xf] }
 0x4b0   :  { %313 = vrot.lane.b32.xlu0 %v1277_v37, %s1447_s19 }
 0x521   :  { %v286_v38 = vpop.permute.xlu1 %285 }
 0x522   :  { %v288_v39 = vmul.f32 %v1271_v24, %v286_v38  ;;  %v314_v40 = vpop.permute.xlu0 %313 }
 0x523   :  { %v316_v41 = vmul.f32 %v1273_v26, %v314_v40 }
 0x524   :  { %v324_v42 = vrot.slane %v288_v39, %v1526_v12 }
 0x525   :  { %v337_v43 = vrot.slane %v316_v41, %v1526_v12 }
 0x526   :  { %325 = vrot.lane.b32.xlu1 %v324_v42, %s1446_s3 }
 0x527   :  { %338 = vrot.lane.b32.xlu0 %v337_v43, %s1447_s19 }
 0x598   :  { %v326_v44 = vpop.permute.xlu1 %325 }
 0x599   :  { %329 = vst.msk [vmem:[#allocation2 + $0x2] sm:$0x3] %vm198_vm1, %v326_v44  ;;  %v339_v45 = vpop.permute.xlu0 %338 }
 0x59a   :  { %342 = vst.msk [vmem:[#allocation2 + $0xc] sm:$0x3] %vm212_vm3, %v339_v45  ;;  %v343_v46 = vsel %vm33_vm2, %v326_v44, %v339_v45 }
 0x59b   :  { %v344_v47 = vpack.c.bf16 %v343_v46, %v343_v46 }
 0x59d   :  { %1196 = vmatmul.mubr.msk.bf16.vlgmr.msra.gmra.mrb[4].mxu0 %vm75_vm0, %v344_v47 }
 0x59e   :  { %607 = vmatpush1.bf16.msra.mxu0 %v1496_v2  ;;  %638 = vmatprep.mubr.bf16.mxu0 %v1444_v3 }
 0x59f   :  { %608 = vmatprep.subr.bf16.mxu0 %v1504_v4 }
 0x5a2   :  { %609 = vmatpush1.bf16.msra.mxu0 %v1511_v8 }
 0x5a3   :  { %610 = vmatprep.subr.bf16.mxu0 %v1518_v9 }
 0x5a6   :  { %611 = vmatpush1.bf16.msra.mxu0 %v1532_v13 }
 0x5a7   :  { %612 = vmatprep.subr.bf16.mxu0 %v1539_v14 }
 0x5aa   :  { %613 = vmatpush1.bf16.msra.mxu0 %v1549_v16 }
 0x5ab   :  { %856 = vmatprep.subr.bf16.mxu0 %v1491_v0 }
 0x670   :  { %v382_v51 = vpop.f32.mrb[4].mxu0 }
 0x671   :  { %v393_v52 = vadd.f32 %v1197_v49, %v382_v51  ;;  %v384_v53 = vpop.f32.mrb[5].mxu0 }
 0x672   :  { %v421_v54 = vadd.f32 %v419_v50, %v384_v53  ;;  %v386_v55 = vpop.f32.mrb[6].mxu0 }
 0x673   :  { %1278 = vtanh.f32 %v393_v52  ;;  %v387_v56 = vpop.f32.mrb[7].mxu0  ;;  %v1199_v59 = vmul.f32 -1.442695, %v393_v52 }
 0x674   :  { %1280 = vtanh.f32 %v421_v54  ;;  %v1200_v60 = vmul.f32 -1.442695, %v421_v54 }
 0x675   :  { %1282 = vpow2.f32 %v1199_v59 }
 0x676   :  { %1284 = vpow2.f32 %v1200_v60 }
 0x67d   :  { %v1279_v57 = vpop.eup %1278 }
 0x67e   :  { %v1281_v58 = vpop.eup %1280  ;;  %403 = vrot.lane.b32.xlu1 %v1279_v57, %s1447_s19 }
 0x67f   :  { %431 = vrot.lane.b32.xlu0 %v1281_v58, %s1447_s19  ;;  %v1283_v61 = vpop.eup %1282 }
 0x680   :  { %v1285_v62 = vpop.eup %1284  ;;  %v397_v63 = vadd.f32 1.0, %v1283_v61 }
 0x681   :  { %v425_v1 = vadd.f32 1.0, %v1285_v62 }
 0x682   :  { %1286 = vrcp.f32 %v397_v63 }
 0x683   :  { %1288 = vrcp.f32 %v425_v1 }
 0x68c   :  { %v1287_v5 = vpop.eup %1286 }
 0x68d   :  { %v1289_v7 = vpop.eup %1288  ;;  %v401_v17 = vmul.f32 %v1287_v5, %v1619_v33 }
 0x68e   :  { %v429_v19 = vmul.f32 %v1289_v7, %v1621_v35  ;;  %v1203_v35 = vld [vmem:[%s1872_s0 + $0x10] sm:$0xf] }
 0x68f   :  { %v548_v37 = vrot.slane %v1203_v35, 2 }
 0x6f0   :  { %v404_v6 = vpop.permute.xlu1 %403 }
 0x6f1   :  { %v406_v10 = vmul.f32 %v1287_v5, %v404_v6  ;;  %v432_v11 = vpop.permute.xlu0 %431 }
 0x6f2   :  { %v434_v15 = vmul.f32 %v1289_v7, %v432_v11 }
 0x6f3   :  { %408 = vrot.lane.b32.xlu1 %v406_v10, %s1446_s3 }
 0x6f4   :  { %436 = vrot.lane.b32.xlu0 %v434_v15, %s1446_s3 }
 0x765   :  { %v409_v18 = vpop.permute.xlu1 %408 }
 0x766   :  { %v1656_v20 = vadd.f32 %v409_v18, %v401_v17  ;;  %v437_v21 = vpop.permute.xlu0 %436 }
 0x767   :  { %v1658_v22 = vadd.f32 %v437_v21, %v429_v19  ;;  %v1208_v21 = vld [vmem:[%s1872_s0 + $0xc] sm:$0xf] }
 0x768   :  { %1290 = vtanh.f32 %v1656_v20 }
 0x769   :  { %1292 = vtanh.f32 %v1658_v22 }
 0x772   :  { %v1291_v23 = vpop.eup %1290 }
 0x773   :  { %v1293_v24 = vpop.eup %1292  ;;  %414 = vrot.lane.b32.xlu1 %v1291_v23, %s1447_s19  ;;  %v675_v23 = vrot.slane %v1208_v21, 2 }
 0x774   :  { %442 = vrot.lane.b32.xlu0 %v1293_v24, %s1447_s19 }
 0x7e5   :  { %v415_v25 = vpop.permute.xlu1 %414 }
 0x7e6   :  { %v417_v26 = vmul.f32 %v1287_v5, %v415_v25  ;;  %v443_v27 = vpop.permute.xlu0 %442 }
 0x7e7   :  { %v445_v28 = vmul.f32 %v1289_v7, %v443_v27 }
 0x7e8   :  { %v453_v29 = vrot.slane %v417_v26, %v1526_v12 }
 0x7e9   :  { %v466_v30 = vrot.slane %v445_v28, %v1526_v12 }
 0x7ea   :  { %454 = vrot.lane.b32.xlu1 %v453_v29, %s1446_s3 }
 0x7eb   :  { %467 = vrot.lane.b32.xlu0 %v466_v30, %s1447_s19 }
 0x85c   :  { %v455_v31 = vpop.permute.xlu1 %454 }
 0x85d   :  { %458 = vst.msk [vmem:[#allocation2 + $0x4] sm:$0x3] %vm198_vm1, %v455_v31  ;;  %v468_v32 = vpop.permute.xlu0 %467 }
 0x85e   :  { %471 = vst.msk [vmem:[#allocation2 + $0xa] sm:$0x3] %vm212_vm3, %v468_v32  ;;  %v472_v33 = vsel %vm33_vm2, %v455_v31, %v468_v32 }
 0x85f   :  { %v473_v34 = vpack.c.bf16 %v472_v33, %v472_v33 }
 0x861   :  { %1201 = vmatmul.mubr.msk.bf16.vlgmr.msra.gmra.mrb[4].mxu1 %vm75_vm0, %v473_v34 }
 0x862   :  { %732 = vmatpush1.bf16.msra.mxu1 %v1496_v2  ;;  %763 = vmatprep.mubr.bf16.mxu1 %v1444_v3 }
 0x863   :  { %733 = vmatprep.subr.bf16.mxu1 %v1504_v4 }
 0x866   :  { %734 = vmatpush1.bf16.msra.mxu1 %v1511_v8 }
 0x867   :  { %735 = vmatprep.subr.bf16.mxu1 %v1518_v9 }
 0x86a   :  { %736 = vmatpush1.bf16.msra.mxu1 %v1532_v13 }
 0x86b   :  { %737 = vmatprep.subr.bf16.mxu1 %v1539_v14 }
 0x86e   :  { %738 = vmatpush1.bf16.msra.mxu1 %v1549_v16 }
 0x86f   :  { %981 = vmatprep.subr.bf16.mxu1 %v1491_v0 }
 0x934   :  { %v511_v38 = vpop.f32.mrb[4].mxu1 }
 0x935   :  { %v522_v39 = vadd.f32 %v1202_v36, %v511_v38  ;;  %v513_v40 = vpop.f32.mrb[5].mxu1 }
 0x936   :  { %v550_v41 = vadd.f32 %v548_v37, %v513_v40  ;;  %v515_v42 = vpop.f32.mrb[6].mxu1 }
 0x937   :  { %1294 = vtanh.f32 %v522_v39  ;;  %v516_v43 = vpop.f32.mrb[7].mxu1  ;;  %v1204_v0 = vmul.f32 -1.442695, %v522_v39 }
 0x938   :  { %1296 = vtanh.f32 %v550_v41  ;;  %v1205_v46 = vmul.f32 -1.442695, %v550_v41 }
 0x939   :  { %1298 = vpow2.f32 %v1204_v0 }
 0x93a   :  { %1300 = vpow2.f32 %v1205_v46 }
 0x941   :  { %v1295_v44 = vpop.eup %1294 }
 0x942   :  { %v1297_v45 = vpop.eup %1296  ;;  %532 = vrot.lane.b32.xlu1 %v1295_v44, %s1447_s19 }
 0x943   :  { %560 = vrot.lane.b32.xlu0 %v1297_v45, %s1447_s19  ;;  %v1299_v47 = vpop.eup %1298 }
 0x944   :  { %v1301_v48 = vpop.eup %1300  ;;  %v526_v49 = vadd.f32 1.0, %v1299_v47 }
 0x945   :  { %v554_v50 = vadd.f32 1.0, %v1301_v48 }
 0x946   :  { %1302 = vrcp.f32 %v526_v49 }
 0x947   :  { %1304 = vrcp.f32 %v554_v50 }
 0x950   :  { %v1303_v51 = vpop.eup %1302 }
 0x951   :  { %v1305_v53 = vpop.eup %1304  ;;  %v530_v57 = vmul.f32 %v1303_v51, %v1656_v20 }
 0x952   :  { %v558_v59 = vmul.f32 %v1305_v53, %v1658_v22  ;;  %v1207_v22 = vld [vmem:[%s1872_s0 + $0x10] sm:$0xf] }
 0x9b4   :  { %v533_v52 = vpop.permute.xlu1 %532 }
 0x9b5   :  { %v535_v54 = vmul.f32 %v1303_v51, %v533_v52  ;;  %v561_v55 = vpop.permute.xlu0 %560 }
 0x9b6   :  { %v563_v56 = vmul.f32 %v1305_v53, %v561_v55 }
 0x9b7   :  { %537 = vrot.lane.b32.xlu1 %v535_v54, %s1446_s3 }
 0x9b8   :  { %565 = vrot.lane.b32.xlu0 %v563_v56, %s1446_s3 }
 0xa29   :  { %v538_v58 = vpop.permute.xlu1 %537 }
 0xa2a   :  { %v1693_v60 = vadd.f32 %v538_v58, %v530_v57  ;;  %v566_v61 = vpop.permute.xlu0 %565 }
 0xa2b   :  { %v1695_v62 = vadd.f32 %v566_v61, %v558_v59  ;;  %v1213_v61 = vld [vmem:[%s1872_s0 + $0x8] sm:$0xf] }
 0xa2c   :  { %1306 = vtanh.f32 %v1693_v60 }
 0xa2d   :  { %1308 = vtanh.f32 %v1695_v62 }
 0xa36   :  { %v1307_v63 = vpop.eup %1306 }
 0xa37   :  { %v1309_v1 = vpop.eup %1308  ;;  %543 = vrot.lane.b32.xlu1 %v1307_v63, %s1447_s19 }
 0xa38   :  { %571 = vrot.lane.b32.xlu0 %v1309_v1, %s1447_s19 }
 0xaa9   :  { %v544_v5 = vpop.permute.xlu1 %543 }
 0xaaa   :  { %v546_v6 = vmul.f32 %v1303_v51, %v544_v5  ;;  %v572_v7 = vpop.permute.xlu0 %571 }
 0xaab   :  { %v574_v10 = vmul.f32 %v1305_v53, %v572_v7 }
 0xaac   :  { %v582_v11 = vrot.slane %v546_v6, %v1526_v12 }
 0xaad   :  { %v595_v15 = vrot.slane %v574_v10, %v1526_v12 }
 0xaae   :  { %583 = vrot.lane.b32.xlu1 %v582_v11, %s1446_s3 }
 0xaaf   :  { %596 = vrot.lane.b32.xlu0 %v595_v15, %s1447_s19 }
 0xb20   :  { %v584_v17 = vpop.permute.xlu1 %583 }
 0xb21   :  { %587 = vst.msk [vmem:[#allocation2 + $0x6] sm:$0x3] %vm198_vm1, %v584_v17  ;;  %v597_v18 = vpop.permute.xlu0 %596 }
 0xb22   :  { %600 = vst.msk [vmem:[#allocation2 + $0x8] sm:$0x3] %vm212_vm3, %v597_v18  ;;  %v601_v19 = vsel %vm33_vm2, %v584_v17, %v597_v18 }
 0xb23   :  { %v602_v20 = vpack.c.bf16 %v601_v19, %v601_v19 }
 0xb25   :  { %1206 = vmatmul.mubr.msk.bf16.vlgmr.msra.gmra.mrb[8].mxu0 %vm75_vm0, %v602_v20 }
 0xb26   :  { %857 = vmatpush1.bf16.msra.mxu0 %v1496_v2  ;;  %888 = vmatprep.mubr.bf16.mxu0 %v1444_v3 }
 0xb27   :  { %858 = vmatprep.subr.bf16.mxu0 %v1504_v4 }
 0xb2a   :  { %859 = vmatpush1.bf16.msra.mxu0 %v1511_v8 }
 0xb2b   :  { %860 = vmatprep.subr.bf16.mxu0 %v1518_v9 }
 0xb2e   :  { %861 = vmatpush1.bf16.msra.mxu0 %v1532_v13 }
 0xb2f   :  { %862 = vmatprep.subr.bf16.mxu0 %v1539_v14 }
 0xb32   :  { %863 = vmatpush1.bf16.msra.mxu0 %v1549_v16 }
 0xbf8   :  { %v640_v24 = vpop.f32.mrb[8].mxu0 }
 0xbf9   :  { %v649_v25 = vadd.f32 %v1207_v22, %v640_v24  ;;  %v642_v26 = vpop.f32.mrb[9].mxu0 }
 0xbfa   :  { %v677_v27 = vadd.f32 %v675_v23, %v642_v26  ;;  %v644_v28 = vpop.f32.mrb[10].mxu0 }
 0xbfb   :  { %1310 = vtanh.f32 %v649_v25  ;;  %v645_v29 = vpop.f32.mrb[11].mxu0  ;;  %v1209_v32 = vmul.f32 -1.442695, %v649_v25 }
 0xbfc   :  { %1312 = vtanh.f32 %v677_v27  ;;  %v1210_v33 = vmul.f32 -1.442695, %v677_v27 }
 0xbfd   :  { %1314 = vpow2.f32 %v1209_v32 }
 0xbfe   :  { %1316 = vpow2.f32 %v1210_v33 }
 0xc05   :  { %v1311_v30 = vpop.eup %1310 }
 0xc06   :  { %v1313_v31 = vpop.eup %1312  ;;  %659 = vrot.lane.b32.xlu1 %v1311_v30, %s1447_s19 }
 0xc07   :  { %687 = vrot.lane.b32.xlu0 %v1313_v31, %s1447_s19  ;;  %v1315_v34 = vpop.eup %1314 }
 0xc08   :  { %v1317_v35 = vpop.eup %1316  ;;  %v653_v36 = vadd.f32 1.0, %v1315_v34 }
 0xc09   :  { %v681_v37 = vadd.f32 1.0, %v1317_v35 }
 0xc0a   :  { %1318 = vrcp.f32 %v653_v36 }
 0xc0b   :  { %1320 = vrcp.f32 %v681_v37 }
 0xc14   :  { %v1319_v38 = vpop.eup %1318 }
 0xc15   :  { %v1321_v40 = vpop.eup %1320  ;;  %v657_v44 = vmul.f32 %v1319_v38, %v1693_v60 }
 0xc16   :  { %v685_v0 = vmul.f32 %v1321_v40, %v1695_v62 }
 0xc78   :  { %v660_v39 = vpop.permute.xlu1 %659 }
 0xc79   :  { %v662_v41 = vmul.f32 %v1319_v38, %v660_v39  ;;  %v688_v42 = vpop.permute.xlu0 %687 }
 0xc7a   :  { %v690_v43 = vmul.f32 %v1321_v40, %v688_v42 }
 0xc7b   :  { %664 = vrot.lane.b32.xlu1 %v662_v41, %s1446_s3  ;;  %v1217_v41 = vld [vmem:[%s1872_s0 + $0x18] sm:$0xf] }
 0xc7c   :  { %692 = vrot.lane.b32.xlu0 %v690_v43, %s1446_s3 }
 0xced   :  { %v665_v45 = vpop.permute.xlu1 %664 }
 0xcee   :  { %v1729_v46 = vadd.f32 %v665_v45, %v657_v44  ;;  %v693_v47 = vpop.permute.xlu0 %692 }
 0xcef   :  { %v1731_v48 = vadd.f32 %v693_v47, %v685_v0 }
 0xcf0   :  { %1322 = vtanh.f32 %v1729_v46 }
 0xcf1   :  { %1324 = vtanh.f32 %v1731_v48 }
 0xcfa   :  { %v1323_v49 = vpop.eup %1322 }
 0xcfb   :  { %v1325_v50 = vpop.eup %1324  ;;  %670 = vrot.lane.b32.xlu1 %v1323_v49, %s1447_s19 }
 0xcfc   :  { %698 = vrot.lane.b32.xlu0 %v1325_v50, %s1447_s19 }
 0xd6d   :  { %v671_v51 = vpop.permute.xlu1 %670 }
 0xd6e   :  { %v673_v52 = vmul.f32 %v1319_v38, %v671_v51  ;;  %v699_v53 = vpop.permute.xlu0 %698 }
 0xd6f   :  { %v701_v54 = vmul.f32 %v1321_v40, %v699_v53  ;;  %v1218_v40 = vld [vmem:[%s1872_s0 + $0x4] sm:$0xf] }
 0xd70   :  { %v709_v55 = vrot.slane %v673_v52, %v1526_v12  ;;  %v925_v42 = vrot.slane %v1218_v40, 2 }
 0xd71   :  { %v721_v56 = vrot.slane %v701_v54, %v1526_v12 }
 0xd72   :  { %710 = vrot.lane.b32.xlu1 %v709_v55, %s1446_s3 }
 0xd73   :  { %722 = vrot.lane.b32.xlu0 %v721_v56, %s1447_s19 }
 0xde4   :  { %v711_v57 = vpop.permute.xlu1 %710 }
 0xde5   :  { %713 = vst.msk [vmem:[#allocation2 + $0x8] sm:$0x3] %vm198_vm1, %v711_v57  ;;  %v723_v58 = vpop.permute.xlu0 %722 }
 0xde6   :  { %725 = vst.msk [vmem:[#allocation2 + $0x6] sm:$0x3] %vm212_vm3, %v723_v58  ;;  %v726_v59 = vsel %vm33_vm2, %v711_v57, %v723_v58 }
 0xde7   :  { %v727_v60 = vpack.c.bf16 %v726_v59, %v726_v59 }
 0xde9   :  { %1211 = vmatmul.mubr.msk.bf16.vlgmr.msra.gmra.mrb[8].mxu1 %vm75_vm0, %v727_v60 }
 0xdea   :  { %982 = vmatpush1.bf16.msra.mxu1 %v1496_v2  ;;  %1013 = vmatprep.mubr.bf16.mxu1 %v1444_v3  ;;  %v1212_v2 = vld [vmem:[%s1872_s0 + $0x14] sm:$0xf]  ;;  %v800_v3 = vrot.slane %v1213_v61, 2 }
 0xdeb   :  { %983 = vmatprep.subr.bf16.mxu1 %v1504_v4 }
 0xdee   :  { %984 = vmatpush1.bf16.msra.mxu1 %v1511_v8 }
 0xdef   :  { %985 = vmatprep.subr.bf16.mxu1 %v1518_v9 }
 0xdf2   :  { %986 = vmatpush1.bf16.msra.mxu1 %v1532_v13 }
 0xdf3   :  { %987 = vmatprep.subr.bf16.mxu1 %v1539_v14 }
 0xdf6   :  { %988 = vmatpush1.bf16.msra.mxu1 %v1549_v16 }
 0xebc   :  { %v765_v4 = vpop.f32.mrb[8].mxu1 }
 0xebd   :  { %v774_v62 = vadd.f32 %v1212_v2, %v765_v4  ;;  %v767_v8 = vpop.f32.mrb[9].mxu1 }
 0xebe   :  { %v802_v63 = vadd.f32 %v800_v3, %v767_v8  ;;  %v769_v9 = vpop.f32.mrb[10].mxu1 }
 0xebf   :  { %1326 = vtanh.f32 %v774_v62  ;;  %v770_v13 = vpop.f32.mrb[11].mxu1  ;;  %v1214_v16 = vmul.f32 -1.442695, %v774_v62 }
 0xec0   :  { %1328 = vtanh.f32 %v802_v63  ;;  %v1215_v5 = vmul.f32 -1.442695, %v802_v63 }
 0xec1   :  { %1330 = vpow2.f32 %v1214_v16 }
 0xec2   :  { %1332 = vpow2.f32 %v1215_v5 }
 0xec9   :  { %v1327_v14 = vpop.eup %1326 }
 0xeca   :  { %v1329_v1 = vpop.eup %1328  ;;  %784 = vrot.lane.b32.xlu1 %v1327_v14, %s1447_s19 }
 0xecb   :  { %812 = vrot.lane.b32.xlu0 %v1329_v1, %s1447_s19  ;;  %v1331_v6 = vpop.eup %1330 }
 0xecc   :  { %v1333_v7 = vpop.eup %1332  ;;  %v778_v10 = vadd.f32 1.0, %v1331_v6 }
 0xecd   :  { %v806_v11 = vadd.f32 1.0, %v1333_v7 }
 0xece   :  { %1334 = vrcp.f32 %v778_v10 }
 0xecf   :  { %1336 = vrcp.f32 %v806_v11 }
 0xed8   :  { %v1335_v15 = vpop.eup %1334 }
 0xed9   :  { %v1337_v18 = vpop.eup %1336  ;;  %v782_v22 = vmul.f32 %v1335_v15, %v1729_v46 }
 0xeda   :  { %v810_v24 = vmul.f32 %v1337_v18, %v1731_v48 }
 0xf3c   :  { %v785_v17 = vpop.permute.xlu1 %784 }
 0xf3d   :  { %v787_v19 = vmul.f32 %v1335_v15, %v785_v17  ;;  %v813_v20 = vpop.permute.xlu0 %812 }
 0xf3e   :  { %v815_v21 = vmul.f32 %v1337_v18, %v813_v20 }
 0xf3f   :  { %789 = vrot.lane.b32.xlu1 %v787_v19, %s1446_s3  ;;  %v1222_v19 = vld [vmem:[%s1872_s0 + $0x1c] sm:$0xf] }
 0xf40   :  { %817 = vrot.lane.b32.xlu0 %v815_v21, %s1446_s3 }
 0xfb1   :  { %v790_v23 = vpop.permute.xlu1 %789 }
 0xfb2   :  { %v792_v25 = vadd.f32 %v790_v23, %v782_v22  ;;  %v818_v26 = vpop.permute.xlu0 %817 }
 0xfb3   :  { %v820_v27 = vadd.f32 %v818_v26, %v810_v24 }
 0xfb4   :  { %1338 = vtanh.f32 %v792_v25 }
 0xfb5   :  { %1340 = vtanh.f32 %v820_v27 }
 0xfbe   :  { %v1339_v28 = vpop.eup %1338 }
 0xfbf   :  { %v1341_v29 = vpop.eup %1340  ;;  %795 = vrot.lane.b32.xlu1 %v1339_v28, %s1447_s19 }
 0xfc0   :  { %823 = vrot.lane.b32.xlu0 %v1341_v29, %s1447_s19 }
0x1031   :  { %v796_v30 = vpop.permute.xlu1 %795 }
0x1032   :  { %v798_v31 = vmul.f32 %v1335_v15, %v796_v30  ;;  %v824_v32 = vpop.permute.xlu0 %823 }
0x1033   :  { %v826_v33 = vmul.f32 %v1337_v18, %v824_v32  ;;  %v1023_v18 = vld [vmem:[%s1872_s0] sm:$0xf]  ;;  %s1448_s0 = smov 96  }
0x1034   :  { %v834_v34 = vrot.slane %v798_v31, %v1526_v12  ;;  %v1050_v20 = vrot.slane %v1023_v18, 2 }
0x1035   :  { %v846_v35 = vrot.slane %v826_v33, %v1526_v12 }
0x1036   :  { %835 = vrot.lane.b32.xlu1 %v834_v34, %s1446_s3 }
0x1037   :  { %847 = vrot.lane.b32.xlu0 %v846_v35, %s1447_s19 }
0x10a8   :  { %v836_v36 = vpop.permute.xlu1 %835 }
0x10a9   :  { %838 = vst.msk [vmem:[#allocation2 + $0xa] sm:$0x3] %vm198_vm1, %v836_v36  ;;  %v848_v37 = vpop.permute.xlu0 %847 }
0x10aa   :  { %850 = vst.msk [vmem:[#allocation2 + $0x4] sm:$0x3] %vm212_vm3, %v848_v37  ;;  %v851_v38 = vsel %vm33_vm2, %v836_v36, %v848_v37 }
0x10ab   :  { %v852_v39 = vpack.c.bf16 %v851_v38, %v851_v38 }
0x10ad   :  { %1216 = vmatmul.mubr.msk.bf16.vlgmr.msra.gmra.mrb[12].mxu0 %vm75_vm0, %v852_v39 }
0x1180   :  { %v890_v43 = vpop.f32.mrb[12].mxu0 }
0x1181   :  { %v899_v44 = vadd.f32 %v1217_v41, %v890_v43  ;;  %v892_v45 = vpop.f32.mrb[13].mxu0 }
0x1182   :  { %v927_v0 = vadd.f32 %v925_v42, %v892_v45  ;;  %v894_v46 = vpop.f32.mrb[14].mxu0 }
0x1183   :  { %1342 = vtanh.f32 %v899_v44  ;;  %v895_v47 = vpop.f32.mrb[15].mxu0  ;;  %v1219_v50 = vmul.f32 -1.442695, %v899_v44 }
0x1184   :  { %1344 = vtanh.f32 %v927_v0  ;;  %v1220_v51 = vmul.f32 -1.442695, %v927_v0 }
0x1185   :  { %1346 = vpow2.f32 %v1219_v50 }
0x1186   :  { %1348 = vpow2.f32 %v1220_v51 }
0x118d   :  { %v1343_v48 = vpop.eup %1342 }
0x118e   :  { %v1345_v49 = vpop.eup %1344  ;;  %909 = vrot.lane.b32.xlu1 %v1343_v48, %s1447_s19 }
0x118f   :  { %937 = vrot.lane.b32.xlu0 %v1345_v49, %s1447_s19  ;;  %v1347_v52 = vpop.eup %1346 }
0x1190   :  { %v1349_v53 = vpop.eup %1348  ;;  %v903_v54 = vadd.f32 1.0, %v1347_v52 }
0x1191   :  { %v931_v55 = vadd.f32 1.0, %v1349_v53 }
0x1192   :  { %1350 = vrcp.f32 %v903_v54 }
0x1193   :  { %1352 = vrcp.f32 %v931_v55 }
0x119c   :  { %v1351_v56 = vpop.eup %1350 }
0x119d   :  { %v1353_v58 = vpop.eup %1352  ;;  %v907_v2 = vmul.f32 %v1351_v56, %v792_v25 }
0x119e   :  { %v935_v4 = vmul.f32 %v1353_v58, %v820_v27 }
0x1200   :  { %v910_v57 = vpop.permute.xlu1 %909 }
0x1201   :  { %v912_v59 = vmul.f32 %v1351_v56, %v910_v57  ;;  %v938_v60 = vpop.permute.xlu0 %937 }
0x1202   :  { %v940_v61 = vmul.f32 %v1353_v58, %v938_v60 }
0x1203   :  { %914 = vrot.lane.b32.xlu1 %v912_v59, %s1446_s3 }
0x1204   :  { %942 = vrot.lane.b32.xlu0 %v940_v61, %s1446_s3 }
0x1275   :  { %v915_v3 = vpop.permute.xlu1 %914 }
0x1276   :  { %v917_v62 = vadd.f32 %v915_v3, %v907_v2  ;;  %v943_v8 = vpop.permute.xlu0 %942 }
0x1277   :  { %v945_v63 = vadd.f32 %v943_v8, %v935_v4 }
0x1278   :  { %1354 = vtanh.f32 %v917_v62 }
0x1279   :  { %1356 = vtanh.f32 %v945_v63 }
0x1282   :  { %v1355_v9 = vpop.eup %1354 }
0x1283   :  { %v1357_v13 = vpop.eup %1356  ;;  %920 = vrot.lane.b32.xlu1 %v1355_v9, %s1447_s19 }
0x1284   :  { %948 = vrot.lane.b32.xlu0 %v1357_v13, %s1447_s19 }
0x12f5   :  { %v921_v14 = vpop.permute.xlu1 %920 }
0x12f6   :  { %v923_v1 = vmul.f32 %v1351_v56, %v921_v14  ;;  %v949_v16 = vpop.permute.xlu0 %948 }
0x12f7   :  { %v951_v5 = vmul.f32 %v1353_v58, %v949_v16 }
0x12f8   :  { %v959_v6 = vrot.slane %v923_v1, %v1526_v12 }
0x12f9   :  { %v971_v7 = vrot.slane %v951_v5, %v1526_v12 }
0x12fa   :  { %960 = vrot.lane.b32.xlu1 %v959_v6, %s1446_s3 }
0x12fb   :  { %972 = vrot.lane.b32.xlu0 %v971_v7, %s1447_s19 }
0x136c   :  { %v961_v10 = vpop.permute.xlu1 %960 }
0x136d   :  { %963 = vst.msk [vmem:[#allocation2 + $0xc] sm:$0x3] %vm198_vm1, %v961_v10  ;;  %v973_v11 = vpop.permute.xlu0 %972 }
0x136e   :  { %975 = vst.msk [vmem:[#allocation2 + $0x2] sm:$0x3] %vm212_vm3, %v973_v11  ;;  %v976_v15 = vsel %vm33_vm2, %v961_v10, %v973_v11 }
0x136f   :  { %v977_v17 = vpack.c.bf16 %v976_v15, %v976_v15 }
0x1371   :  { %1221 = vmatmul.mubr.msk.bf16.vlgmr.msra.gmra.mrb[12].mxu1 %vm75_vm0, %v977_v17 }
0x1444   :  { %v1015_v21 = vpop.f32.mrb[12].mxu1 }
0x1445   :  { %v1024_v22 = vadd.f32 %v1222_v19, %v1015_v21  ;;  %v1017_v23 = vpop.f32.mrb[13].mxu1 }
0x1446   :  { %v1052_v24 = vadd.f32 %v1050_v20, %v1017_v23  ;;  %v1019_v25 = vpop.f32.mrb[14].mxu1 }
0x1447   :  { %1358 = vtanh.f32 %v1024_v22  ;;  %v1020_v26 = vpop.f32.mrb[15].mxu1  ;;  %v1223_v29 = vmul.f32 -1.442695, %v1024_v22 }
0x1448   :  { %1360 = vtanh.f32 %v1052_v24  ;;  %v1224_v30 = vmul.f32 -1.442695, %v1052_v24 }
0x1449   :  { %1362 = vpow2.f32 %v1223_v29 }
0x144a   :  { %1364 = vpow2.f32 %v1224_v30 }
0x1451   :  { %v1359_v27 = vpop.eup %1358 }
0x1452   :  { %v1361_v28 = vpop.eup %1360  ;;  %1034 = vrot.lane.b32.xlu1 %v1359_v27, %s1447_s19 }
0x1453   :  { %1062 = vrot.lane.b32.xlu0 %v1361_v28, %s1447_s19  ;;  %v1363_v31 = vpop.eup %1362 }
0x1454   :  { %v1365_v32 = vpop.eup %1364  ;;  %v1028_v33 = vadd.f32 1.0, %v1363_v31 }
0x1455   :  { %v1056_v34 = vadd.f32 1.0, %v1365_v32 }
0x1456   :  { %1366 = vrcp.f32 %v1028_v33 }
0x1457   :  { %1368 = vrcp.f32 %v1056_v34 }
0x1460   :  { %v1367_v35 = vpop.eup %1366 }
0x1461   :  { %v1369_v37 = vpop.eup %1368  ;;  %v1032_v41 = vmul.f32 %v1367_v35, %v917_v62 }
0x1462   :  { %v1060_v43 = vmul.f32 %v1369_v37, %v945_v63 }
0x14c4   :  { %v1035_v36 = vpop.permute.xlu1 %1034 }
0x14c5   :  { %v1037_v38 = vmul.f32 %v1367_v35, %v1035_v36  ;;  %v1063_v39 = vpop.permute.xlu0 %1062 }
0x14c6   :  { %v1065_v40 = vmul.f32 %v1369_v37, %v1063_v39 }
0x14c7   :  { %1039 = vrot.lane.b32.xlu1 %v1037_v38, %s1446_s3 }
0x14c8   :  { %1067 = vrot.lane.b32.xlu0 %v1065_v40, %s1446_s3 }
0x1539   :  { %v1040_v42 = vpop.permute.xlu1 %1039 }
0x153a   :  { %v1042_v44 = vadd.f32 %v1040_v42, %v1032_v41  ;;  %v1068_v45 = vpop.permute.xlu0 %1067 }
0x153b   :  { %v1070_v0 = vadd.f32 %v1068_v45, %v1060_v43 }
0x153c   :  { %1370 = vtanh.f32 %v1042_v44  ;;  %v1114_v54 = vrot.slane %v1042_v44, %v1526_v12 }
0x153d   :  { %1372 = vtanh.f32 %v1070_v0  ;;  %v1126_v55 = vrot.slane %v1070_v0, %v1526_v12 }
0x1546   :  { %v1371_v46 = vpop.eup %1370 }
0x1547   :  { %v1373_v47 = vpop.eup %1372  ;;  %1045 = vrot.lane.b32.xlu1 %v1371_v46, %s1447_s19 }
0x1548   :  { %1073 = vrot.lane.b32.xlu0 %v1373_v47, %s1447_s19 }
0x15b9   :  { %v1046_v48 = vpop.permute.xlu1 %1045 }
0x15ba   :  { %v1048_v49 = vmul.f32 %v1367_v35, %v1046_v48  ;;  %v1074_v50 = vpop.permute.xlu0 %1073 }
0x15bb   :  { %v1076_v51 = vmul.f32 %v1369_v37, %v1074_v50 }
0x15bc   :  { %v1084_v52 = vrot.slane %v1048_v49, %v1526_v12 }
0x15bd   :  { %v1096_v53 = vrot.slane %v1076_v51, %v1526_v12 }
0x15be   :  { %1085 = vrot.lane.b32.xlu1 %v1084_v52, %s1446_s3 }
0x15bf   :  { %1102 = vrot.lane.b32.xlu0 %v1096_v53, %s1446_s3 }
0x15c2   :  { %1097 = vrot.lane.b32.xlu1 %v1096_v53, %s1447_s19  ;;  %s1374_s19 = scalar_lea.vmem %s1150_s24, 64 }
0x15c3   :  { %1115 = vrot.lane.b32.xlu0 %v1114_v54, %s1448_s0  ;;  %p1375_p0 = scmp.ne.s32.totalorder %s1150_s24, %s1374_s19  ;;  %p1380_p2 = scmp.lt.s32.totalorder %s1374_s19, %s1374_s19 }
0x15c5   :  { %p1381_p3 = por %p1380_p2, %p1379_p1 }
0x15c6   :  { %1127 = vrot.lane.b32.xlu1 %v1126_v55, %s1448_s0 }
0x15c7   :  { %p1382_p4 = pnand %p1381_p3, %p1375_p0 }
0x1630   :  { %v1086_v56 = vpop.permute.xlu1 %1085 }
0x1631   :  { %1088 = vst.msk [vmem:[#allocation2 + $0xe] sm:$0x3] %vm198_vm1, %v1086_v56  ;;  %1101 = vst.msk [vmem:[#allocation4] sm:$0x3] %vm198_vm1, %v1086_v56  ;;  %v1103_v57 = vpop.permute.xlu0 %1102 }
0x1632   :  { %1106 = vst.msk [vmem:[#allocation4 + $0x2] sm:$0x3] %vm198_vm1, %v1103_v57 }
0x1633   :  { %1385 = shalt.err (!%p1382_p4)
}
0x1634   :  { %s1386_s29 = scalar_lea.hbm %s1877_s5, 64 }
0x1635   :  { %p1387_p5 = scmp.ne.s32.totalorder %s1877_s5, %s1386_s29  ;;  %p1390_p6 = scmp.lt.u32.totalorder %s1386_s29, %s1877_s5 }
0x1637   :  { %p1392_p7 = pnand %p1390_p6, %p1387_p5 }
0x1639   :  { %1395 = shalt.err (!%p1392_p7)
}
0x163a   :  { %s1451_s10 = smov 2   ;;  %v1098_v12 = vpop.permute.xlu1 %1097  ;;  %s1452_s13 = smov [#allocation6]   ;;  %v1116_v58 = vpop.permute.xlu0 %1115 }
0x163b   :  { %1155 = dma.vmem_to_hbm [thread:$0]  %s1150_s24, 64, %s1877_s5, [#allocation5], %s1446_s3, %s1446_s3, %s1451_s10   ;;  %1100 = vst.msk [vmem:[#allocation2] sm:$0x3] %vm212_vm3, %v1098_v12 }
0x163c   :  { %s1161_s14 = sshll.u32 %s1452_s13, 4  ;;  %1118 = vst.msk [vmem:[#allocation6] sm:$0x3] %vm198_vm1, %v1116_v58  ;;  %s1396_s15 = scalar_lea.vmem %s1817_s26, 256  ;;  %s1162_s14 = int_to_ptr.vmem [resolvable:$true] %s1161_s14 }
0x163d   :  { %p1397_p8 = scmp.ne.s32.totalorder %s1817_s26, %s1396_s15  ;;  %p1401_p9 = scmp.lt.s32.totalorder %s1817_s26, %s1817_s26 }
0x163e   :  { %p1402_p10 = scmp.lt.s32.totalorder %s1396_s15, %s1396_s15 }
0x1640   :  { %p1403_p11 = por %p1402_p10, %p1401_p9 }
0x1642   :  { %p1404_p12 = pnand %p1403_p11, %p1397_p8 }
0x1644   :  { %1407 = shalt.err (!%p1404_p12)
}
0x1645   :  { %s1408_s5 = scalar_lea.hbm %s1876_s4, 256 }
0x1646   :  { %p1409_p13 = scmp.ne.s32.totalorder %s1876_s4, %s1408_s5  ;;  %p1412_p0 = scmp.lt.u32.totalorder %s1408_s5, %s1876_s4 }
0x1648   :  { %p1414_p1 = pnand %p1412_p0, %p1409_p13 }
0x164a   :  { %1417 = shalt.err (!%p1414_p1)
}
0x164b   :  { %1143 = dma.vmem_to_hbm [thread:$0]  %s1817_s26, 256, %s1876_s4, [#allocation3], %s1446_s3, %s1446_s3, %s1451_s10   ;;  %v1128_v59 = vpop.permute.xlu1 %1127 }
0x164c   :  { %1131 = vst.msk [vmem:[#allocation6 + $0x2] sm:$0x3] %vm198_vm1, %v1128_v59  ;;  %s1418_s0 = scalar_lea.vmem %s1162_s14, 64  ;;  %p1423_p3 = scmp.lt.s32.totalorder %s1162_s14, %s1162_s14 }
0x164d   :  { %p1419_p2 = scmp.ne.s32.totalorder %s1162_s14, %s1418_s0  ;;  %p1424_p4 = scmp.lt.s32.totalorder %s1418_s0, %s1418_s0 }
0x164f   :  { %p1425_p5 = por %p1424_p4, %p1423_p3 }
0x1651   :  { %p1426_p6 = pnand %p1425_p5, %p1419_p2 }
0x1653   :  { %1429 = shalt.err (!%p1426_p6)
}
0x1654   :  { %s1430_s25 = scalar_lea.hbm %s1878_s6, 64 }
0x1655   :  { %p1431_p7 = scmp.ne.s32.totalorder %s1878_s6, %s1430_s25  ;;  %p1434_p8 = scmp.lt.u32.totalorder %s1430_s25, %s1878_s6 }
0x1657   :  { %p1436_p9 = pnand %p1434_p8, %p1431_p7 }
0x1659   :  { %1439 = shalt.err (!%p1436_p9)
}
0x165a   :  { %1167 = dma.vmem_to_hbm [thread:$0]  %s1162_s14, 64, %s1878_s6, [#allocation5], %s1446_s3, %s1446_s3, %s1451_s10  }
0x165b   :  { %1440 = dma.done.wait [#allocation3], 256  }
0x165c   :  { %1441 = vsyncadd [#allocation3], 4294967040 }
0x165d   :  { %1442 = dma.done.wait [#allocation5], 128  }
0x165e   :  { %1443 = vsyncadd [#allocation5], 4294967168 }
0x165f   :  { %1177 = vsyncpa [#allocation3], 1 }
0x1660   :  { %1178 = vsyncpa [#allocation5], 1 }

</bundles_post_ra>
